<compile_context>
chip_gen: v5e
topology: v5e:2x2
jax: 0.10.0
libtpu: 0.0.40
codegen_flags: <defaults>
</compile_context>

<pallas_src>
import math

import jax
import jax.numpy as jnp
from jax.experimental import pallas as pl
from jax.experimental.pallas import tpu as pltpu


# Tokens gathered per grid step (amortizes per-step overhead, keeps TILE_N row
# DMAs in flight to hide per-row DMA latency).
TILE_N = 32


def _pe_gather_kernel(doy_ref, pe_hbm, out_ref, buf, sems):
    # doy_ref: [N_pad] int32 in SMEM (scalar prefetch) -- indices only.
    # pe_hbm : [L, D]  f32 left in HBM (memory_space=pl.ANY), DMA'd manually.
    # out_ref: [TILE_N, D] f32 VMEM output tile (auto-pipelined by Pallas).
    # buf    : [TILE_N, D] f32 VMEM scratch -- DMA landing zone.
    # sems   : TILE_N DMA semaphores (one per in-flight row fetch).
    base = pl.program_id(0) * TILE_N

    # Issue all row fetches first (TILE_N DMAs in flight), then wait.
    copies = []
    for t in range(TILE_N):                    # static unroll
        row = doy_ref[base + t]                # scalar read from SMEM
        cp = pltpu.make_async_copy(pe_hbm.at[row], buf.at[t], sems.at[t])
        cp.start()
        copies.append(cp)
    for cp in copies:
        cp.wait()

    # One contiguous store of the gathered tile; writeback overlapped by the
    # Pallas output pipeline.
    out_ref[...] = buf[...]


def make_pe_table(d_model: int, max_len: int = 5000, T: int = 10000) -> jnp.ndarray:
    """Deterministic buffer init, same formula as the torch module."""
    position = jnp.arange(max_len, dtype=jnp.float32)[:, None]            # [max_len, 1]
    div_term = jnp.exp(
        jnp.arange(0, d_model, 2, dtype=jnp.float32) * (-math.log(T) / d_model)
    )                                                                     # [d_model/2]
    pe = jnp.zeros((max_len + 1, d_model), dtype=jnp.float32)
    pe = pe.at[1:, 0::2].set(jnp.sin(position * div_term))
    pe = pe.at[1:, 1::2].set(jnp.cos(position * div_term))
    return pe


def positional_encoding_lookup(doy: jnp.ndarray, pe: jnp.ndarray) -> jnp.ndarray:
    """doy: [B, S] int -> [B, S, D] float32 (== pe[doy])."""
    b, s = doy.shape
    l, d = pe.shape
    n = b * s
    n_pad = ((n + TILE_N - 1) // TILE_N) * TILE_N

    # Clamp indices: torch's pe[doy] would raise on OOB; clamping avoids an
    # out-of-bounds HBM DMA (see correctness note in the review).
    doy_flat = jnp.clip(doy.reshape(n).astype(jnp.int32), 0, l - 1)
    # Pad with 0 -> gathers pe[0] (all-zero row); padded rows sliced off below.
    doy_flat = jnp.pad(doy_flat, (0, n_pad - n))

    grid = (n_pad // TILE_N,)

    out = pl.pallas_call(
        _pe_gather_kernel,
        out_shape=jax.ShapeDtypeStruct((n_pad, d), jnp.float32),
        grid_spec=pltpu.PrefetchScalarGridSpec(
            num_scalar_prefetch=1,                         # doy -> SMEM
            grid=grid,
            in_specs=[
                pl.BlockSpec(memory_space=pl.ANY),         # pe stays in HBM
            ],
            out_specs=pl.BlockSpec((TILE_N, d), lambda i, doy: (i, 0)),
            scratch_shapes=[
                pltpu.VMEM((TILE_N, d), jnp.float32),      # gather landing zone
                pltpu.SemaphoreType.DMA((TILE_N,)),        # one sem per row DMA
            ],
        ),
        compiler_params=pltpu.CompilerParams(
            dimension_semantics=("parallel",),             # 2x on v7x dual TC
        ),
    )(doy_flat, pe)

    return out[:n].reshape(b, s, d)


if __name__ == "__main__":
    # Small, forward-consistent shapes.
    batch, seq_len = 2, 8
    d_model, max_len, T = 32, 64, 10000

    pe = make_pe_table(d_model, max_len=max_len, T=T)      # [65, 32]

    key = jax.random.PRNGKey(0)
    doy = jax.random.randint(key, (batch, seq_len), 0, max_len + 1, dtype=jnp.int32)

    out = positional_encoding_lookup(doy, pe)
    out = jax.block_until_ready(out)

    # Reference check (plain JAX gather).
    ref = pe[doy]
    assert out.shape == (batch, seq_len, d_model)
    assert out.dtype == jnp.float32
    assert jnp.allclose(out, ref, atol=1e-6), "mismatch vs reference gather"

    print("KERNEL_OK")
</pallas_src>

<mosaic_0001>
module attributes {stable_mosaic.version = 11 : i64} {
  func.func @_pe_gather_kernel(%arg0: i32, %arg1: memref<32xi32, #tpu.memory_space<smem>>, %arg2: memref<65x32xf32, #tpu.memory_space<any>>, %arg3: memref<32x32xf32, #tpu.memory_space<vmem>>, %arg4: memref<32x32xf32, #tpu.memory_space<vmem>>, %arg5: memref<32x!tpu.dma_semaphore, #tpu.memory_space<semaphore_mem>>) attributes {dimension_semantics = [#tpu.dimension_semantics<parallel>], iteration_bounds = array<i64: 1>, scalar_prefetch = 1 : i64, scratch_operands = 2 : i64, tpu.core_type = #tpu.core_type<tc>, window_params = [{}, {transform_indices = @transform_1, window_bounds = array<i64: 32, 32>}]} {
    %c32_i32 = arith.constant 32 : i32
    %0 = arith.muli %arg0, %c32_i32 : i32
    %c0_i32 = arith.constant 0 : i32
    %1 = arith.addi %0, %c0_i32 : i32
    %2 = arith.index_cast %1 : i32 to index
    %3 = memref.load %arg1[%2] : memref<32xi32, #tpu.memory_space<smem>>
    %c0_i32_0 = arith.constant 0 : i32
    %c0_i32_1 = arith.constant 0 : i32
    %c0_i32_2 = arith.constant 0 : i32
    %4 = tpu.memref_slice %arg2[%3, %c0_i32_2] : memref<65x32xf32, #tpu.memory_space<any>> -> memref<1x32xf32, #tpu.memory_space<any>>
    %5 = tpu.memref_squeeze %4 : memref<1x32xf32, #tpu.memory_space<any>> -> memref<32xf32, #tpu.memory_space<any>>
    %c0_i32_3 = arith.constant 0 : i32
    %6 = tpu.memref_slice %arg4[%c0_i32_0, %c0_i32_3] : memref<32x32xf32, #tpu.memory_space<vmem>> -> memref<1x32xf32, #tpu.memory_space<vmem>>
    %7 = tpu.memref_squeeze %6 : memref<1x32xf32, #tpu.memory_space<vmem>> -> memref<32xf32, #tpu.memory_space<vmem>>
    %8 = tpu.memref_slice %arg5[%c0_i32_1] : memref<32x!tpu.dma_semaphore, #tpu.memory_space<semaphore_mem>> -> memref<1x!tpu.dma_semaphore, #tpu.memory_space<semaphore_mem>>
    %9 = tpu.memref_squeeze %8 : memref<1x!tpu.dma_semaphore, #tpu.memory_space<semaphore_mem>> -> memref<!tpu.dma_semaphore, #tpu.memory_space<semaphore_mem>>
    tpu.enqueue_dma source(%5 : memref<32xf32, #tpu.memory_space<any>>) target(%7 : memref<32xf32, #tpu.memory_space<vmem>>) target_semaphore(%9 : memref<!tpu.dma_semaphore, #tpu.memory_space<semaphore_mem>>)
    %c1_i32 = arith.constant 1 : i32
    %10 = arith.addi %0, %c1_i32 : i32
    %11 = arith.index_cast %10 : i32 to index
    %12 = memref.load %arg1[%11] : memref<32xi32, #tpu.memory_space<smem>>
    %c1_i32_4 = arith.constant 1 : i32
    %c1_i32_5 = arith.constant 1 : i32
    %c0_i32_6 = arith.constant 0 : i32
    %13 = tpu.memref_slice %arg2[%12, %c0_i32_6] : memref<65x32xf32, #tpu.memory_space<any>> -> memref<1x32xf32, #tpu.memory_space<any>>
    %14 = tpu.memref_squeeze %13 : memref<1x32xf32, #tpu.memory_space<any>> -> memref<32xf32, #tpu.memory_space<any>>
    %c0_i32_7 = arith.constant 0 : i32
    %15 = tpu.memref_slice %arg4[%c1_i32_4, %c0_i32_7] : memref<32x32xf32, #tpu.memory_space<vmem>> -> memref<1x32xf32, #tpu.memory_space<vmem>>
    %16 = tpu.memref_squeeze %15 : memref<1x32xf32, #tpu.memory_space<vmem>> -> memref<32xf32, #tpu.memory_space<vmem>>
    %17 = tpu.memref_slice %arg5[%c1_i32_5] : memref<32x!tpu.dma_semaphore, #tpu.memory_space<semaphore_mem>> -> memref<1x!tpu.dma_semaphore, #tpu.memory_space<semaphore_mem>>
    %18 = tpu.memref_squeeze %17 : memref<1x!tpu.dma_semaphore, #tpu.memory_space<semaphore_mem>> -> memref<!tpu.dma_semaphore, #tpu.memory_space<semaphore_mem>>
    tpu.enqueue_dma source(%14 : memref<32xf32, #tpu.memory_space<any>>) target(%16 : memref<32xf32, #tpu.memory_space<vmem>>) target_semaphore(%18 : memref<!tpu.dma_semaphore, #tpu.memory_space<semaphore_mem>>)
    %c2_i32 = arith.constant 2 : i32
    %19 = arith.addi %0, %c2_i32 : i32
    %20 = arith.index_cast %19 : i32 to index
    %21 = memref.load %arg1[%20] : memref<32xi32, #tpu.memory_space<smem>>
    %c2_i32_8 = arith.constant 2 : i32
    %c2_i32_9 = arith.constant 2 : i32
    %c0_i32_10 = arith.constant 0 : i32
    %22 = tpu.memref_slice %arg2[%21, %c0_i32_10] : memref<65x32xf32, #tpu.memory_space<any>> -> memref<1x32xf32, #tpu.memory_space<any>>
    %23 = tpu.memref_squeeze %22 : memref<1x32xf32, #tpu.memory_space<any>> -> memref<32xf32, #tpu.memory_space<any>>
    %c0_i32_11 = arith.constant 0 : i32
    %24 = tpu.memref_slice %arg4[%c2_i32_8, %c0_i32_11] : memref<32x32xf32, #tpu.memory_space<vmem>> -> memref<1x32xf32, #tpu.memory_space<vmem>>
    %25 = tpu.memref_squeeze %24 : memref<1x32xf32, #tpu.memory_space<vmem>> -> memref<32xf32, #tpu.memory_space<vmem>>
    %26 = tpu.memref_slice %arg5[%c2_i32_9] : memref<32x!tpu.dma_semaphore, #tpu.memory_space<semaphore_mem>> -> memref<1x!tpu.dma_semaphore, #tpu.memory_space<semaphore_mem>>
    %27 = tpu.memref_squeeze %26 : memref<1x!tpu.dma_semaphore, #tpu.memory_space<semaphore_mem>> -> memref<!tpu.dma_semaphore, #tpu.memory_space<semaphore_mem>>
    tpu.enqueue_dma source(%23 : memref<32xf32, #tpu.memory_space<any>>) target(%25 : memref<32xf32, #tpu.memory_space<vmem>>) target_semaphore(%27 : memref<!tpu.dma_semaphore, #tpu.memory_space<semaphore_mem>>)
    %c3_i32 = arith.constant 3 : i32
    %28 = arith.addi %0, %c3_i32 : i32
    %29 = arith.index_cast %28 : i32 to index
    %30 = memref.load %arg1[%29] : memref<32xi32, #tpu.memory_space<smem>>
    %c3_i32_12 = arith.constant 3 : i32
    %c3_i32_13 = arith.constant 3 : i32
    %c0_i32_14 = arith.constant 0 : i32
    %31 = tpu.memref_slice %arg2[%30, %c0_i32_14] : memref<65x32xf32, #tpu.memory_space<any>> -> memref<1x32xf32, #tpu.memory_space<any>>
    %32 = tpu.memref_squeeze %31 : memref<1x32xf32, #tpu.memory_space<any>> -> memref<32xf32, #tpu.memory_space<any>>
    %c0_i32_15 = arith.constant 0 : i32
    %33 = tpu.memref_slice %arg4[%c3_i32_12, %c0_i32_15] : memref<32x32xf32, #tpu.memory_space<vmem>> -> memref<1x32xf32, #tpu.memory_space<vmem>>
    %34 = tpu.memref_squeeze %33 : memref<1x32xf32, #tpu.memory_space<vmem>> -> memref<32xf32, #tpu.memory_space<vmem>>
    %35 = tpu.memref_slice %arg5[%c3_i32_13] : memref<32x!tpu.dma_semaphore, #tpu.memory_space<semaphore_mem>> -> memref<1x!tpu.dma_semaphore, #tpu.memory_space<semaphore_mem>>
    %36 = tpu.memref_squeeze %35 : memref<1x!tpu.dma_semaphore, #tpu.memory_space<semaphore_mem>> -> memref<!tpu.dma_semaphore, #tpu.memory_space<semaphore_mem>>
    tpu.enqueue_dma source(%32 : memref<32xf32, #tpu.memory_space<any>>) target(%34 : memref<32xf32, #tpu.memory_space<vmem>>) target_semaphore(%36 : memref<!tpu.dma_semaphore, #tpu.memory_space<semaphore_mem>>)
    %c4_i32 = arith.constant 4 : i32
    %37 = arith.addi %0, %c4_i32 : i32
    %38 = arith.index_cast %37 : i32 to index
    %39 = memref.load %arg1[%38] : memref<32xi32, #tpu.memory_space<smem>>
    %c4_i32_16 = arith.constant 4 : i32
    %c4_i32_17 = arith.constant 4 : i32
    %c0_i32_18 = arith.constant 0 : i32
    %40 = tpu.memref_slice %arg2[%39, %c0_i32_18] : memref<65x32xf32, #tpu.memory_space<any>> -> memref<1x32xf32, #tpu.memory_space<any>>
    %41 = tpu.memref_squeeze %40 : memref<1x32xf32, #tpu.memory_space<any>> -> memref<32xf32, #tpu.memory_space<any>>
    %c0_i32_19 = arith.constant 0 : i32
    %42 = tpu.memref_slice %arg4[%c4_i32_16, %c0_i32_19] : memref<32x32xf32, #tpu.memory_space<vmem>> -> memref<1x32xf32, #tpu.memory_space<vmem>>
    %43 = tpu.memref_squeeze %42 : memref<1x32xf32, #tpu.memory_space<vmem>> -> memref<32xf32, #tpu.memory_space<vmem>>
    %44 = tpu.memref_slice %arg5[%c4_i32_17] : memref<32x!tpu.dma_semaphore, #tpu.memory_space<semaphore_mem>> -> memref<1x!tpu.dma_semaphore, #tpu.memory_space<semaphore_mem>>
    %45 = tpu.memref_squeeze %44 : memref<1x!tpu.dma_semaphore, #tpu.memory_space<semaphore_mem>> -> memref<!tpu.dma_semaphore, #tpu.memory_space<semaphore_mem>>
    tpu.enqueue_dma source(%41 : memref<32xf32, #tpu.memory_space<any>>) target(%43 : memref<32xf32, #tpu.memory_space<vmem>>) target_semaphore(%45 : memref<!tpu.dma_semaphore, #tpu.memory_space<semaphore_mem>>)
    %c5_i32 = arith.constant 5 : i32
    %46 = arith.addi %0, %c5_i32 : i32
    %47 = arith.index_cast %46 : i32 to index
    %48 = memref.load %arg1[%47] : memref<32xi32, #tpu.memory_space<smem>>
    %c5_i32_20 = arith.constant 5 : i32
    %c5_i32_21 = arith.constant 5 : i32
    %c0_i32_22 = arith.constant 0 : i32
    %49 = tpu.memref_slice %arg2[%48, %c0_i32_22] : memref<65x32xf32, #tpu.memory_space<any>> -> memref<1x32xf32, #tpu.memory_space<any>>
    %50 = tpu.memref_squeeze %49 : memref<1x32xf32, #tpu.memory_space<any>> -> memref<32xf32, #tpu.memory_space<any>>
    %c0_i32_23 = arith.constant 0 : i32
    %51 = tpu.memref_slice %arg4[%c5_i32_20, %c0_i32_23] : memref<32x32xf32, #tpu.memory_space<vmem>> -> memref<1x32xf32, #tpu.memory_space<vmem>>
    %52 = tpu.memref_squeeze %51 : memref<1x32xf32, #tpu.memory_space<vmem>> -> memref<32xf32, #tpu.memory_space<vmem>>
    %53 = tpu.memref_slice %arg5[%c5_i32_21] : memref<32x!tpu.dma_semaphore, #tpu.memory_space<semaphore_mem>> -> memref<1x!tpu.dma_semaphore, #tpu.memory_space<semaphore_mem>>
    %54 = tpu.memref_squeeze %53 : memref<1x!tpu.dma_semaphore, #tpu.memory_space<semaphore_mem>> -> memref<!tpu.dma_semaphore, #tpu.memory_space<semaphore_mem>>
    tpu.enqueue_dma source(%50 : memref<32xf32, #tpu.memory_space<any>>) target(%52 : memref<32xf32, #tpu.memory_space<vmem>>) target_semaphore(%54 : memref<!tpu.dma_semaphore, #tpu.memory_space<semaphore_mem>>)
    %c6_i32 = arith.constant 6 : i32
    %55 = arith.addi %0, %c6_i32 : i32
    %56 = arith.index_cast %55 : i32 to index
    %57 = memref.load %arg1[%56] : memref<32xi32, #tpu.memory_space<smem>>
    %c6_i32_24 = arith.constant 6 : i32
    %c6_i32_25 = arith.constant 6 : i32
    %c0_i32_26 = arith.constant 0 : i32
    %58 = tpu.memref_slice %arg2[%57, %c0_i32_26] : memref<65x32xf32, #tpu.memory_space<any>> -> memref<1x32xf32, #tpu.memory_space<any>>
    %59 = tpu.memref_squeeze %58 : memref<1x32xf32, #tpu.memory_space<any>> -> memref<32xf32, #tpu.memory_space<any>>
    %c0_i32_27 = arith.constant 0 : i32
    %60 = tpu.memref_slice %arg4[%c6_i32_24, %c0_i32_27] : memref<32x32xf32, #tpu.memory_space<vmem>> -> memref<1x32xf32, #tpu.memory_space<vmem>>
    %61 = tpu.memref_squeeze %60 : memref<1x32xf32, #tpu.memory_space<vmem>> -> memref<32xf32, #tpu.memory_space<vmem>>
    %62 = tpu.memref_slice %arg5[%c6_i32_25] : memref<32x!tpu.dma_semaphore, #tpu.memory_space<semaphore_mem>> -> memref<1x!tpu.dma_semaphore, #tpu.memory_space<semaphore_mem>>
    %63 = tpu.memref_squeeze %62 : memref<1x!tpu.dma_semaphore, #tpu.memory_space<semaphore_mem>> -> memref<!tpu.dma_semaphore, #tpu.memory_space<semaphore_mem>>
    tpu.enqueue_dma source(%59 : memref<32xf32, #tpu.memory_space<any>>) target(%61 : memref<32xf32, #tpu.memory_space<vmem>>) target_semaphore(%63 : memref<!tpu.dma_semaphore, #tpu.memory_space<semaphore_mem>>)
    %c7_i32 = arith.constant 7 : i32
    %64 = arith.addi %0, %c7_i32 : i32
    %65 = arith.index_cast %64 : i32 to index
    %66 = memref.load %arg1[%65] : memref<32xi32, #tpu.memory_space<smem>>
    %c7_i32_28 = arith.constant 7 : i32
    %c7_i32_29 = arith.constant 7 : i32
    %c0_i32_30 = arith.constant 0 : i32
    %67 = tpu.memref_slice %arg2[%66, %c0_i32_30] : memref<65x32xf32, #tpu.memory_space<any>> -> memref<1x32xf32, #tpu.memory_space<any>>
    %68 = tpu.memref_squeeze %67 : memref<1x32xf32, #tpu.memory_space<any>> -> memref<32xf32, #tpu.memory_space<any>>
    %c0_i32_31 = arith.constant 0 : i32
    %69 = tpu.memref_slice %arg4[%c7_i32_28, %c0_i32_31] : memref<32x32xf32, #tpu.memory_space<vmem>> -> memref<1x32xf32, #tpu.memory_space<vmem>>
    %70 = tpu.memref_squeeze %69 : memref<1x32xf32, #tpu.memory_space<vmem>> -> memref<32xf32, #tpu.memory_space<vmem>>
    %71 = tpu.memref_slice %arg5[%c7_i32_29] : memref<32x!tpu.dma_semaphore, #tpu.memory_space<semaphore_mem>> -> memref<1x!tpu.dma_semaphore, #tpu.memory_space<semaphore_mem>>
    %72 = tpu.memref_squeeze %71 : memref<1x!tpu.dma_semaphore, #tpu.memory_space<semaphore_mem>> -> memref<!tpu.dma_semaphore, #tpu.memory_space<semaphore_mem>>
    tpu.enqueue_dma source(%68 : memref<32xf32, #tpu.memory_space<any>>) target(%70 : memref<32xf32, #tpu.memory_space<vmem>>) target_semaphore(%72 : memref<!tpu.dma_semaphore, #tpu.memory_space<semaphore_mem>>)
    %c8_i32 = arith.constant 8 : i32
    %73 = arith.addi %0, %c8_i32 : i32
    %74 = arith.index_cast %73 : i32 to index
    %75 = memref.load %arg1[%74] : memref<32xi32, #tpu.memory_space<smem>>
    %c8_i32_32 = arith.constant 8 : i32
    %c8_i32_33 = arith.constant 8 : i32
    %c0_i32_34 = arith.constant 0 : i32
    %76 = tpu.memref_slice %arg2[%75, %c0_i32_34] : memref<65x32xf32, #tpu.memory_space<any>> -> memref<1x32xf32, #tpu.memory_space<any>>
    %77 = tpu.memref_squeeze %76 : memref<1x32xf32, #tpu.memory_space<any>> -> memref<32xf32, #tpu.memory_space<any>>
    %c0_i32_35 = arith.constant 0 : i32
    %78 = tpu.memref_slice %arg4[%c8_i32_32, %c0_i32_35] : memref<32x32xf32, #tpu.memory_space<vmem>> -> memref<1x32xf32, #tpu.memory_space<vmem>>
    %79 = tpu.memref_squeeze %78 : memref<1x32xf32, #tpu.memory_space<vmem>> -> memref<32xf32, #tpu.memory_space<vmem>>
    %80 = tpu.memref_slice %arg5[%c8_i32_33] : memref<32x!tpu.dma_semaphore, #tpu.memory_space<semaphore_mem>> -> memref<1x!tpu.dma_semaphore, #tpu.memory_space<semaphore_mem>>
    %81 = tpu.memref_squeeze %80 : memref<1x!tpu.dma_semaphore, #tpu.memory_space<semaphore_mem>> -> memref<!tpu.dma_semaphore, #tpu.memory_space<semaphore_mem>>
    tpu.enqueue_dma source(%77 : memref<32xf32, #tpu.memory_space<any>>) target(%79 : memref<32xf32, #tpu.memory_space<vmem>>) target_semaphore(%81 : memref<!tpu.dma_semaphore, #tpu.memory_space<semaphore_mem>>)
    %c9_i32 = arith.constant 9 : i32
    %82 = arith.addi %0, %c9_i32 : i32
    %83 = arith.index_cast %82 : i32 to index
    %84 = memref.load %arg1[%83] : memref<32xi32, #tpu.memory_space<smem>>
    %c9_i32_36 = arith.constant 9 : i32
    %c9_i32_37 = arith.constant 9 : i32
    %c0_i32_38 = arith.constant 0 : i32
    %85 = tpu.memref_slice %arg2[%84, %c0_i32_38] : memref<65x32xf32, #tpu.memory_space<any>> -> memref<1x32xf32, #tpu.memory_space<any>>
    %86 = tpu.memref_squeeze %85 : memref<1x32xf32, #tpu.memory_space<any>> -> memref<32xf32, #tpu.memory_space<any>>
    %c0_i32_39 = arith.constant 0 : i32
    %87 = tpu.memref_slice %arg4[%c9_i32_36, %c0_i32_39] : memref<32x32xf32, #tpu.memory_space<vmem>> -> memref<1x32xf32, #tpu.memory_space<vmem>>
    %88 = tpu.memref_squeeze %87 : memref<1x32xf32, #tpu.memory_space<vmem>> -> memref<32xf32, #tpu.memory_space<vmem>>
    %89 = tpu.memref_slice %arg5[%c9_i32_37] : memref<32x!tpu.dma_semaphore, #tpu.memory_space<semaphore_mem>> -> memref<1x!tpu.dma_semaphore, #tpu.memory_space<semaphore_mem>>
    %90 = tpu.memref_squeeze %89 : memref<1x!tpu.dma_semaphore, #tpu.memory_space<semaphore_mem>> -> memref<!tpu.dma_semaphore, #tpu.memory_space<semaphore_mem>>
    tpu.enqueue_dma source(%86 : memref<32xf32, #tpu.memory_space<any>>) target(%88 : memref<32xf32, #tpu.memory_space<vmem>>) target_semaphore(%90 : memref<!tpu.dma_semaphore, #tpu.memory_space<semaphore_mem>>)
    %c10_i32 = arith.constant 10 : i32
    %91 = arith.addi %0, %c10_i32 : i32
    %92 = arith.index_cast %91 : i32 to index
    %93 = memref.load %arg1[%92] : memref<32xi32, #tpu.memory_space<smem>>
    %c10_i32_40 = arith.constant 10 : i32
    %c10_i32_41 = arith.constant 10 : i32
    %c0_i32_42 = arith.constant 0 : i32
    %94 = tpu.memref_slice %arg2[%93, %c0_i32_42] : memref<65x32xf32, #tpu.memory_space<any>> -> memref<1x32xf32, #tpu.memory_space<any>>
    %95 = tpu.memref_squeeze %94 : memref<1x32xf32, #tpu.memory_space<any>> -> memref<32xf32, #tpu.memory_space<any>>
    %c0_i32_43 = arith.constant 0 : i32
    %96 = tpu.memref_slice %arg4[%c10_i32_40, %c0_i32_43] : memref<32x32xf32, #tpu.memory_space<vmem>> -> memref<1x32xf32, #tpu.memory_space<vmem>>
    %97 = tpu.memref_squeeze %96 : memref<1x32xf32, #tpu.memory_space<vmem>> -> memref<32xf32, #tpu.memory_space<vmem>>
    %98 = tpu.memref_slice %arg5[%c10_i32_41] : memref<32x!tpu.dma_semaphore, #tpu.memory_space<semaphore_mem>> -> memref<1x!tpu.dma_semaphore, #tpu.memory_space<semaphore_mem>>
    %99 = tpu.memref_squeeze %98 : memref<1x!tpu.dma_semaphore, #tpu.memory_space<semaphore_mem>> -> memref<!tpu.dma_semaphore, #tpu.memory_space<semaphore_mem>>
    tpu.enqueue_dma source(%95 : memref<32xf32, #tpu.memory_space<any>>) target(%97 : memref<32xf32, #tpu.memory_space<vmem>>) target_semaphore(%99 : memref<!tpu.dma_semaphore, #tpu.memory_space<semaphore_mem>>)
    %c11_i32 = arith.constant 11 : i32
    %100 = arith.addi %0, %c11_i32 : i32
    %101 = arith.index_cast %100 : i32 to index
    %102 = memref.load %arg1[%101] : memref<32xi32, #tpu.memory_space<smem>>
    %c11_i32_44 = arith.constant 11 : i32
    %c11_i32_45 = arith.constant 11 : i32
    %c0_i32_46 = arith.constant 0 : i32
    %103 = tpu.memref_slice %arg2[%102, %c0_i32_46] : memref<65x32xf32, #tpu.memory_space<any>> -> memref<1x32xf32, #tpu.memory_space<any>>
    %104 = tpu.memref_squeeze %103 : memref<1x32xf32, #tpu.memory_space<any>> -> memref<32xf32, #tpu.memory_space<any>>
    %c0_i32_47 = arith.constant 0 : i32
    %105 = tpu.memref_slice %arg4[%c11_i32_44, %c0_i32_47] : memref<32x32xf32, #tpu.memory_space<vmem>> -> memref<1x32xf32, #tpu.memory_space<vmem>>
    %106 = tpu.memref_squeeze %105 : memref<1x32xf32, #tpu.memory_space<vmem>> -> memref<32xf32, #tpu.memory_space<vmem>>
    %107 = tpu.memref_slice %arg5[%c11_i32_45] : memref<32x!tpu.dma_semaphore, #tpu.memory_space<semaphore_mem>> -> memref<1x!tpu.dma_semaphore, #tpu.memory_space<semaphore_mem>>
    %108 = tpu.memref_squeeze %107 : memref<1x!tpu.dma_semaphore, #tpu.memory_space<semaphore_mem>> -> memref<!tpu.dma_semaphore, #tpu.memory_space<semaphore_mem>>
    tpu.enqueue_dma source(%104 : memref<32xf32, #tpu.memory_space<any>>) target(%106 : memref<32xf32, #tpu.memory_space<vmem>>) target_semaphore(%108 : memref<!tpu.dma_semaphore, #tpu.memory_space<semaphore_mem>>)
    %c12_i32 = arith.constant 12 : i32
    %109 = arith.addi %0, %c12_i32 : i32
    %110 = arith.index_cast %109 : i32 to index
    %111 = memref.load %arg1[%110] : memref<32xi32, #tpu.memory_space<smem>>
    %c12_i32_48 = arith.constant 12 : i32
    %c12_i32_49 = arith.constant 12 : i32
    %c0_i32_50 = arith.constant 0 : i32
    %112 = tpu.memref_slice %arg2[%111, %c0_i32_50] : memref<65x32xf32, #tpu.memory_space<any>> -> memref<1x32xf32, #tpu.memory_space<any>>
    %113 = tpu.memref_squeeze %112 : memref<1x32xf32, #tpu.memory_space<any>> -> memref<32xf32, #tpu.memory_space<any>>
    %c0_i32_51 = arith.constant 0 : i32
    %114 = tpu.memref_slice %arg4[%c12_i32_48, %c0_i32_51] : memref<32x32xf32, #tpu.memory_space<vmem>> -> memref<1x32xf32, #tpu.memory_space<vmem>>
    %115 = tpu.memref_squeeze %114 : memref<1x32xf32, #tpu.memory_space<vmem>> -> memref<32xf32, #tpu.memory_space<vmem>>
    %116 = tpu.memref_slice %arg5[%c12_i32_49] : memref<32x!tpu.dma_semaphore, #tpu.memory_space<semaphore_mem>> -> memref<1x!tpu.dma_semaphore, #tpu.memory_space<semaphore_mem>>
    %117 = tpu.memref_squeeze %116 : memref<1x!tpu.dma_semaphore, #tpu.memory_space<semaphore_mem>> -> memref<!tpu.dma_semaphore, #tpu.memory_space<semaphore_mem>>
    tpu.enqueue_dma source(%113 : memref<32xf32, #tpu.memory_space<any>>) target(%115 : memref<32xf32, #tpu.memory_space<vmem>>) target_semaphore(%117 : memref<!tpu.dma_semaphore, #tpu.memory_space<semaphore_mem>>)
    %c13_i32 = arith.constant 13 : i32
    %118 = arith.addi %0, %c13_i32 : i32
    %119 = arith.index_cast %118 : i32 to index
    %120 = memref.load %arg1[%119] : memref<32xi32, #tpu.memory_space<smem>>
    %c13_i32_52 = arith.constant 13 : i32
    %c13_i32_53 = arith.constant 13 : i32
    %c0_i32_54 = arith.constant 0 : i32
    %121 = tpu.memref_slice %arg2[%120, %c0_i32_54] : memref<65x32xf32, #tpu.memory_space<any>> -> memref<1x32xf32, #tpu.memory_space<any>>
    %122 = tpu.memref_squeeze %121 : memref<1x32xf32, #tpu.memory_space<any>> -> memref<32xf32, #tpu.memory_space<any>>
    %c0_i32_55 = arith.constant 0 : i32
    %123 = tpu.memref_slice %arg4[%c13_i32_52, %c0_i32_55] : memref<32x32xf32, #tpu.memory_space<vmem>> -> memref<1x32xf32, #tpu.memory_space<vmem>>
    %124 = tpu.memref_squeeze %123 : memref<1x32xf32, #tpu.memory_space<vmem>> -> memref<32xf32, #tpu.memory_space<vmem>>
    %125 = tpu.memref_slice %arg5[%c13_i32_53] : memref<32x!tpu.dma_semaphore, #tpu.memory_space<semaphore_mem>> -> memref<1x!tpu.dma_semaphore, #tpu.memory_space<semaphore_mem>>
    %126 = tpu.memref_squeeze %125 : memref<1x!tpu.dma_semaphore, #tpu.memory_space<semaphore_mem>> -> memref<!tpu.dma_semaphore, #tpu.memory_space<semaphore_mem>>
    tpu.enqueue_dma source(%122 : memref<32xf32, #tpu.memory_space<any>>) target(%124 : memref<32xf32, #tpu.memory_space<vmem>>) target_semaphore(%126 : memref<!tpu.dma_semaphore, #tpu.memory_space<semaphore_mem>>)
    %c14_i32 = arith.constant 14 : i32
    %127 = arith.addi %0, %c14_i32 : i32
    %128 = arith.index_cast %127 : i32 to index
    %129 = memref.load %arg1[%128] : memref<32xi32, #tpu.memory_space<smem>>
    %c14_i32_56 = arith.constant 14 : i32
    %c14_i32_57 = arith.constant 14 : i32
    %c0_i32_58 = arith.constant 0 : i32
    %130 = tpu.memref_slice %arg2[%129, %c0_i32_58] : memref<65x32xf32, #tpu.memory_space<any>> -> memref<1x32xf32, #tpu.memory_space<any>>
    %131 = tpu.memref_squeeze %130 : memref<1x32xf32, #tpu.memory_space<any>> -> memref<32xf32, #tpu.memory_space<any>>
    %c0_i32_59 = arith.constant 0 : i32
    %132 = tpu.memref_slice %arg4[%c14_i32_56, %c0_i32_59] : memref<32x32xf32, #tpu.memory_space<vmem>> -> memref<1x32xf32, #tpu.memory_space<vmem>>
    %133 = tpu.memref_squeeze %132 : memref<1x32xf32, #tpu.memory_space<vmem>> -> memref<32xf32, #tpu.memory_space<vmem>>
    %134 = tpu.memref_slice %arg5[%c14_i32_57] : memref<32x!tpu.dma_semaphore, #tpu.memory_space<semaphore_mem>> -> memref<1x!tpu.dma_semaphore, #tpu.memory_space<semaphore_mem>>
    %135 = tpu.memref_squeeze %134 : memref<1x!tpu.dma_semaphore, #tpu.memory_space<semaphore_mem>> -> memref<!tpu.dma_semaphore, #tpu.memory_space<semaphore_mem>>
    tpu.enqueue_dma source(%131 : memref<32xf32, #tpu.memory_space<any>>) target(%133 : memref<32xf32, #tpu.memory_space<vmem>>) target_semaphore(%135 : memref<!tpu.dma_semaphore, #tpu.memory_space<semaphore_mem>>)
    %c15_i32 = arith.constant 15 : i32
    %136 = arith.addi %0, %c15_i32 : i32
    %137 = arith.index_cast %136 : i32 to index
    %138 = memref.load %arg1[%137] : memref<32xi32, #tpu.memory_space<smem>>
    %c15_i32_60 = arith.constant 15 : i32
    %c15_i32_61 = arith.constant 15 : i32
    %c0_i32_62 = arith.constant 0 : i32
    %139 = tpu.memref_slice %arg2[%138, %c0_i32_62] : memref<65x32xf32, #tpu.memory_space<any>> -> memref<1x32xf32, #tpu.memory_space<any>>
    %140 = tpu.memref_squeeze %139 : memref<1x32xf32, #tpu.memory_space<any>> -> memref<32xf32, #tpu.memory_space<any>>
    %c0_i32_63 = arith.constant 0 : i32
    %141 = tpu.memref_slice %arg4[%c15_i32_60, %c0_i32_63] : memref<32x32xf32, #tpu.memory_space<vmem>> -> memref<1x32xf32, #tpu.memory_space<vmem>>
    %142 = tpu.memref_squeeze %141 : memref<1x32xf32, #tpu.memory_space<vmem>> -> memref<32xf32, #tpu.memory_space<vmem>>
    %143 = tpu.memref_slice %arg5[%c15_i32_61] : memref<32x!tpu.dma_semaphore, #tpu.memory_space<semaphore_mem>> -> memref<1x!tpu.dma_semaphore, #tpu.memory_space<semaphore_mem>>
    %144 = tpu.memref_squeeze %143 : memref<1x!tpu.dma_semaphore, #tpu.memory_space<semaphore_mem>> -> memref<!tpu.dma_semaphore, #tpu.memory_space<semaphore_mem>>
    tpu.enqueue_dma source(%140 : memref<32xf32, #tpu.memory_space<any>>) target(%142 : memref<32xf32, #tpu.memory_space<vmem>>) target_semaphore(%144 : memref<!tpu.dma_semaphore, #tpu.memory_space<semaphore_mem>>)
    %c16_i32 = arith.constant 16 : i32
    %145 = arith.addi %0, %c16_i32 : i32
    %146 = arith.index_cast %145 : i32 to index
    %147 = memref.load %arg1[%146] : memref<32xi32, #tpu.memory_space<smem>>
    %c16_i32_64 = arith.constant 16 : i32
    %c16_i32_65 = arith.constant 16 : i32
    %c0_i32_66 = arith.constant 0 : i32
    %148 = tpu.memref_slice %arg2[%147, %c0_i32_66] : memref<65x32xf32, #tpu.memory_space<any>> -> memref<1x32xf32, #tpu.memory_space<any>>
    %149 = tpu.memref_squeeze %148 : memref<1x32xf32, #tpu.memory_space<any>> -> memref<32xf32, #tpu.memory_space<any>>
    %c0_i32_67 = arith.constant 0 : i32
    %150 = tpu.memref_slice %arg4[%c16_i32_64, %c0_i32_67] : memref<32x32xf32, #tpu.memory_space<vmem>> -> memref<1x32xf32, #tpu.memory_space<vmem>>
    %151 = tpu.memref_squeeze %150 : memref<1x32xf32, #tpu.memory_space<vmem>> -> memref<32xf32, #tpu.memory_space<vmem>>
    %152 = tpu.memref_slice %arg5[%c16_i32_65] : memref<32x!tpu.dma_semaphore, #tpu.memory_space<semaphore_mem>> -> memref<1x!tpu.dma_semaphore, #tpu.memory_space<semaphore_mem>>
    %153 = tpu.memref_squeeze %152 : memref<1x!tpu.dma_semaphore, #tpu.memory_space<semaphore_mem>> -> memref<!tpu.dma_semaphore, #tpu.memory_space<semaphore_mem>>
    tpu.enqueue_dma source(%149 : memref<32xf32, #tpu.memory_space<any>>) target(%151 : memref<32xf32, #tpu.memory_space<vmem>>) target_semaphore(%153 : memref<!tpu.dma_semaphore, #tpu.memory_space<semaphore_mem>>)
    %c17_i32 = arith.constant 17 : i32
    %154 = arith.addi %0, %c17_i32 : i32
    %155 = arith.index_cast %154 : i32 to index
    %156 = memref.load %arg1[%155] : memref<32xi32, #tpu.memory_space<smem>>
    %c17_i32_68 = arith.constant 17 : i32
    %c17_i32_69 = arith.constant 17 : i32
    %c0_i32_70 = arith.constant 0 : i32
    %157 = tpu.memref_slice %arg2[%156, %c0_i32_70] : memref<65x32xf32, #tpu.memory_space<any>> -> memref<1x32xf32, #tpu.memory_space<any>>
    %158 = tpu.memref_squeeze %157 : memref<1x32xf32, #tpu.memory_space<any>> -> memref<32xf32, #tpu.memory_space<any>>
    %c0_i32_71 = arith.constant 0 : i32
    %159 = tpu.memref_slice %arg4[%c17_i32_68, %c0_i32_71] : memref<32x32xf32, #tpu.memory_space<vmem>> -> memref<1x32xf32, #tpu.memory_space<vmem>>
    %160 = tpu.memref_squeeze %159 : memref<1x32xf32, #tpu.memory_space<vmem>> -> memref<32xf32, #tpu.memory_space<vmem>>
    %161 = tpu.memref_slice %arg5[%c17_i32_69] : memref<32x!tpu.dma_semaphore, #tpu.memory_space<semaphore_mem>> -> memref<1x!tpu.dma_semaphore, #tpu.memory_space<semaphore_mem>>
    %162 = tpu.memref_squeeze %161 : memref<1x!tpu.dma_semaphore, #tpu.memory_space<semaphore_mem>> -> memref<!tpu.dma_semaphore, #tpu.memory_space<semaphore_mem>>
    tpu.enqueue_dma source(%158 : memref<32xf32, #tpu.memory_space<any>>) target(%160 : memref<32xf32, #tpu.memory_space<vmem>>) target_semaphore(%162 : memref<!tpu.dma_semaphore, #tpu.memory_space<semaphore_mem>>)
    %c18_i32 = arith.constant 18 : i32
    %163 = arith.addi %0, %c18_i32 : i32
    %164 = arith.index_cast %163 : i32 to index
    %165 = memref.load %arg1[%164] : memref<32xi32, #tpu.memory_space<smem>>
    %c18_i32_72 = arith.constant 18 : i32
    %c18_i32_73 = arith.constant 18 : i32
    %c0_i32_74 = arith.constant 0 : i32
    %166 = tpu.memref_slice %arg2[%165, %c0_i32_74] : memref<65x32xf32, #tpu.memory_space<any>> -> memref<1x32xf32, #tpu.memory_space<any>>
    %167 = tpu.memref_squeeze %166 : memref<1x32xf32, #tpu.memory_space<any>> -> memref<32xf32, #tpu.memory_space<any>>
    %c0_i32_75 = arith.constant 0 : i32
    %168 = tpu.memref_slice %arg4[%c18_i32_72, %c0_i32_75] : memref<32x32xf32, #tpu.memory_space<vmem>> -> memref<1x32xf32, #tpu.memory_space<vmem>>
    %169 = tpu.memref_squeeze %168 : memref<1x32xf32, #tpu.memory_space<vmem>> -> memref<32xf32, #tpu.memory_space<vmem>>
    %170 = tpu.memref_slice %arg5[%c18_i32_73] : memref<32x!tpu.dma_semaphore, #tpu.memory_space<semaphore_mem>> -> memref<1x!tpu.dma_semaphore, #tpu.memory_space<semaphore_mem>>
    %171 = tpu.memref_squeeze %170 : memref<1x!tpu.dma_semaphore, #tpu.memory_space<semaphore_mem>> -> memref<!tpu.dma_semaphore, #tpu.memory_space<semaphore_mem>>
    tpu.enqueue_dma source(%167 : memref<32xf32, #tpu.memory_space<any>>) target(%169 : memref<32xf32, #tpu.memory_space<vmem>>) target_semaphore(%171 : memref<!tpu.dma_semaphore, #tpu.memory_space<semaphore_mem>>)
    %c19_i32 = arith.constant 19 : i32
    %172 = arith.addi %0, %c19_i32 : i32
    %173 = arith.index_cast %172 : i32 to index
    %174 = memref.load %arg1[%173] : memref<32xi32, #tpu.memory_space<smem>>
    %c19_i32_76 = arith.constant 19 : i32
    %c19_i32_77 = arith.constant 19 : i32
    %c0_i32_78 = arith.constant 0 : i32
    %175 = tpu.memref_slice %arg2[%174, %c0_i32_78] : memref<65x32xf32, #tpu.memory_space<any>> -> memref<1x32xf32, #tpu.memory_space<any>>
    %176 = tpu.memref_squeeze %175 : memref<1x32xf32, #tpu.memory_space<any>> -> memref<32xf32, #tpu.memory_space<any>>
    %c0_i32_79 = arith.constant 0 : i32
    %177 = tpu.memref_slice %arg4[%c19_i32_76, %c0_i32_79] : memref<32x32xf32, #tpu.memory_space<vmem>> -> memref<1x32xf32, #tpu.memory_space<vmem>>
    %178 = tpu.memref_squeeze %177 : memref<1x32xf32, #tpu.memory_space<vmem>> -> memref<32xf32, #tpu.memory_space<vmem>>
    %179 = tpu.memref_slice %arg5[%c19_i32_77] : memref<32x!tpu.dma_semaphore, #tpu.memory_space<semaphore_mem>> -> memref<1x!tpu.dma_semaphore, #tpu.memory_space<semaphore_mem>>
    %180 = tpu.memref_squeeze %179 : memref<1x!tpu.dma_semaphore, #tpu.memory_space<semaphore_mem>> -> memref<!tpu.dma_semaphore, #tpu.memory_space<semaphore_mem>>
    tpu.enqueue_dma source(%176 : memref<32xf32, #tpu.memory_space<any>>) target(%178 : memref<32xf32, #tpu.memory_space<vmem>>) target_semaphore(%180 : memref<!tpu.dma_semaphore, #tpu.memory_space<semaphore_mem>>)
    %c20_i32 = arith.constant 20 : i32
    %181 = arith.addi %0, %c20_i32 : i32
    %182 = arith.index_cast %181 : i32 to index
    %183 = memref.load %arg1[%182] : memref<32xi32, #tpu.memory_space<smem>>
    %c20_i32_80 = arith.constant 20 : i32
    %c20_i32_81 = arith.constant 20 : i32
    %c0_i32_82 = arith.constant 0 : i32
    %184 = tpu.memref_slice %arg2[%183, %c0_i32_82] : memref<65x32xf32, #tpu.memory_space<any>> -> memref<1x32xf32, #tpu.memory_space<any>>
    %185 = tpu.memref_squeeze %184 : memref<1x32xf32, #tpu.memory_space<any>> -> memref<32xf32, #tpu.memory_space<any>>
    %c0_i32_83 = arith.constant 0 : i32
    %186 = tpu.memref_slice %arg4[%c20_i32_80, %c0_i32_83] : memref<32x32xf32, #tpu.memory_space<vmem>> -> memref<1x32xf32, #tpu.memory_space<vmem>>
    %187 = tpu.memref_squeeze %186 : memref<1x32xf32, #tpu.memory_space<vmem>> -> memref<32xf32, #tpu.memory_space<vmem>>
    %188 = tpu.memref_slice %arg5[%c20_i32_81] : memref<32x!tpu.dma_semaphore, #tpu.memory_space<semaphore_mem>> -> memref<1x!tpu.dma_semaphore, #tpu.memory_space<semaphore_mem>>
    %189 = tpu.memref_squeeze %188 : memref<1x!tpu.dma_semaphore, #tpu.memory_space<semaphore_mem>> -> memref<!tpu.dma_semaphore, #tpu.memory_space<semaphore_mem>>
    tpu.enqueue_dma source(%185 : memref<32xf32, #tpu.memory_space<any>>) target(%187 : memref<32xf32, #tpu.memory_space<vmem>>) target_semaphore(%189 : memref<!tpu.dma_semaphore, #tpu.memory_space<semaphore_mem>>)
    %c21_i32 = arith.constant 21 : i32
    %190 = arith.addi %0, %c21_i32 : i32
    %191 = arith.index_cast %190 : i32 to index
    %192 = memref.load %arg1[%191] : memref<32xi32, #tpu.memory_space<smem>>
    %c21_i32_84 = arith.constant 21 : i32
    %c21_i32_85 = arith.constant 21 : i32
    %c0_i32_86 = arith.constant 0 : i32
    %193 = tpu.memref_slice %arg2[%192, %c0_i32_86] : memref<65x32xf32, #tpu.memory_space<any>> -> memref<1x32xf32, #tpu.memory_space<any>>
    %194 = tpu.memref_squeeze %193 : memref<1x32xf32, #tpu.memory_space<any>> -> memref<32xf32, #tpu.memory_space<any>>
    %c0_i32_87 = arith.constant 0 : i32
    %195 = tpu.memref_slice %arg4[%c21_i32_84, %c0_i32_87] : memref<32x32xf32, #tpu.memory_space<vmem>> -> memref<1x32xf32, #tpu.memory_space<vmem>>
    %196 = tpu.memref_squeeze %195 : memref<1x32xf32, #tpu.memory_space<vmem>> -> memref<32xf32, #tpu.memory_space<vmem>>
    %197 = tpu.memref_slice %arg5[%c21_i32_85] : memref<32x!tpu.dma_semaphore, #tpu.memory_space<semaphore_mem>> -> memref<1x!tpu.dma_semaphore, #tpu.memory_space<semaphore_mem>>
    %198 = tpu.memref_squeeze %197 : memref<1x!tpu.dma_semaphore, #tpu.memory_space<semaphore_mem>> -> memref<!tpu.dma_semaphore, #tpu.memory_space<semaphore_mem>>
    tpu.enqueue_dma source(%194 : memref<32xf32, #tpu.memory_space<any>>) target(%196 : memref<32xf32, #tpu.memory_space<vmem>>) target_semaphore(%198 : memref<!tpu.dma_semaphore, #tpu.memory_space<semaphore_mem>>)
    %c22_i32 = arith.constant 22 : i32
    %199 = arith.addi %0, %c22_i32 : i32
    %200 = arith.index_cast %199 : i32 to index
    %201 = memref.load %arg1[%200] : memref<32xi32, #tpu.memory_space<smem>>
    %c22_i32_88 = arith.constant 22 : i32
    %c22_i32_89 = arith.constant 22 : i32
    %c0_i32_90 = arith.constant 0 : i32
    %202 = tpu.memref_slice %arg2[%201, %c0_i32_90] : memref<65x32xf32, #tpu.memory_space<any>> -> memref<1x32xf32, #tpu.memory_space<any>>
    %203 = tpu.memref_squeeze %202 : memref<1x32xf32, #tpu.memory_space<any>> -> memref<32xf32, #tpu.memory_space<any>>
    %c0_i32_91 = arith.constant 0 : i32
    %204 = tpu.memref_slice %arg4[%c22_i32_88, %c0_i32_91] : memref<32x32xf32, #tpu.memory_space<vmem>> -> memref<1x32xf32, #tpu.memory_space<vmem>>
    %205 = tpu.memref_squeeze %204 : memref<1x32xf32, #tpu.memory_space<vmem>> -> memref<32xf32, #tpu.memory_space<vmem>>
    %206 = tpu.memref_slice %arg5[%c22_i32_89] : memref<32x!tpu.dma_semaphore, #tpu.memory_space<semaphore_mem>> -> memref<1x!tpu.dma_semaphore, #tpu.memory_space<semaphore_mem>>
    %207 = tpu.memref_squeeze %206 : memref<1x!tpu.dma_semaphore, #tpu.memory_space<semaphore_mem>> -> memref<!tpu.dma_semaphore, #tpu.memory_space<semaphore_mem>>
    tpu.enqueue_dma source(%203 : memref<32xf32, #tpu.memory_space<any>>) target(%205 : memref<32xf32, #tpu.memory_space<vmem>>) target_semaphore(%207 : memref<!tpu.dma_semaphore, #tpu.memory_space<semaphore_mem>>)
    %c23_i32 = arith.constant 23 : i32
    %208 = arith.addi %0, %c23_i32 : i32
    %209 = arith.index_cast %208 : i32 to index
    %210 = memref.load %arg1[%209] : memref<32xi32, #tpu.memory_space<smem>>
    %c23_i32_92 = arith.constant 23 : i32
    %c23_i32_93 = arith.constant 23 : i32
    %c0_i32_94 = arith.constant 0 : i32
    %211 = tpu.memref_slice %arg2[%210, %c0_i32_94] : memref<65x32xf32, #tpu.memory_space<any>> -> memref<1x32xf32, #tpu.memory_space<any>>
    %212 = tpu.memref_squeeze %211 : memref<1x32xf32, #tpu.memory_space<any>> -> memref<32xf32, #tpu.memory_space<any>>
    %c0_i32_95 = arith.constant 0 : i32
    %213 = tpu.memref_slice %arg4[%c23_i32_92, %c0_i32_95] : memref<32x32xf32, #tpu.memory_space<vmem>> -> memref<1x32xf32, #tpu.memory_space<vmem>>
    %214 = tpu.memref_squeeze %213 : memref<1x32xf32, #tpu.memory_space<vmem>> -> memref<32xf32, #tpu.memory_space<vmem>>
    %215 = tpu.memref_slice %arg5[%c23_i32_93] : memref<32x!tpu.dma_semaphore, #tpu.memory_space<semaphore_mem>> -> memref<1x!tpu.dma_semaphore, #tpu.memory_space<semaphore_mem>>
    %216 = tpu.memref_squeeze %215 : memref<1x!tpu.dma_semaphore, #tpu.memory_space<semaphore_mem>> -> memref<!tpu.dma_semaphore, #tpu.memory_space<semaphore_mem>>
    tpu.enqueue_dma source(%212 : memref<32xf32, #tpu.memory_space<any>>) target(%214 : memref<32xf32, #tpu.memory_space<vmem>>) target_semaphore(%216 : memref<!tpu.dma_semaphore, #tpu.memory_space<semaphore_mem>>)
    %c24_i32 = arith.constant 24 : i32
    %217 = arith.addi %0, %c24_i32 : i32
    %218 = arith.index_cast %217 : i32 to index
    %219 = memref.load %arg1[%218] : memref<32xi32, #tpu.memory_space<smem>>
    %c24_i32_96 = arith.constant 24 : i32
    %c24_i32_97 = arith.constant 24 : i32
    %c0_i32_98 = arith.constant 0 : i32
    %220 = tpu.memref_slice %arg2[%219, %c0_i32_98] : memref<65x32xf32, #tpu.memory_space<any>> -> memref<1x32xf32, #tpu.memory_space<any>>
    %221 = tpu.memref_squeeze %220 : memref<1x32xf32, #tpu.memory_space<any>> -> memref<32xf32, #tpu.memory_space<any>>
    %c0_i32_99 = arith.constant 0 : i32
    %222 = tpu.memref_slice %arg4[%c24_i32_96, %c0_i32_99] : memref<32x32xf32, #tpu.memory_space<vmem>> -> memref<1x32xf32, #tpu.memory_space<vmem>>
    %223 = tpu.memref_squeeze %222 : memref<1x32xf32, #tpu.memory_space<vmem>> -> memref<32xf32, #tpu.memory_space<vmem>>
    %224 = tpu.memref_slice %arg5[%c24_i32_97] : memref<32x!tpu.dma_semaphore, #tpu.memory_space<semaphore_mem>> -> memref<1x!tpu.dma_semaphore, #tpu.memory_space<semaphore_mem>>
    %225 = tpu.memref_squeeze %224 : memref<1x!tpu.dma_semaphore, #tpu.memory_space<semaphore_mem>> -> memref<!tpu.dma_semaphore, #tpu.memory_space<semaphore_mem>>
    tpu.enqueue_dma source(%221 : memref<32xf32, #tpu.memory_space<any>>) target(%223 : memref<32xf32, #tpu.memory_space<vmem>>) target_semaphore(%225 : memref<!tpu.dma_semaphore, #tpu.memory_space<semaphore_mem>>)
    %c25_i32 = arith.constant 25 : i32
    %226 = arith.addi %0, %c25_i32 : i32
    %227 = arith.index_cast %226 : i32 to index
    %228 = memref.load %arg1[%227] : memref<32xi32, #tpu.memory_space<smem>>
    %c25_i32_100 = arith.constant 25 : i32
    %c25_i32_101 = arith.constant 25 : i32
    %c0_i32_102 = arith.constant 0 : i32
    %229 = tpu.memref_slice %arg2[%228, %c0_i32_102] : memref<65x32xf32, #tpu.memory_space<any>> -> memref<1x32xf32, #tpu.memory_space<any>>
    %230 = tpu.memref_squeeze %229 : memref<1x32xf32, #tpu.memory_space<any>> -> memref<32xf32, #tpu.memory_space<any>>
    %c0_i32_103 = arith.constant 0 : i32
    %231 = tpu.memref_slice %arg4[%c25_i32_100, %c0_i32_103] : memref<32x32xf32, #tpu.memory_space<vmem>> -> memref<1x32xf32, #tpu.memory_space<vmem>>
    %232 = tpu.memref_squeeze %231 : memref<1x32xf32, #tpu.memory_space<vmem>> -> memref<32xf32, #tpu.memory_space<vmem>>
    %233 = tpu.memref_slice %arg5[%c25_i32_101] : memref<32x!tpu.dma_semaphore, #tpu.memory_space<semaphore_mem>> -> memref<1x!tpu.dma_semaphore, #tpu.memory_space<semaphore_mem>>
    %234 = tpu.memref_squeeze %233 : memref<1x!tpu.dma_semaphore, #tpu.memory_space<semaphore_mem>> -> memref<!tpu.dma_semaphore, #tpu.memory_space<semaphore_mem>>
    tpu.enqueue_dma source(%230 : memref<32xf32, #tpu.memory_space<any>>) target(%232 : memref<32xf32, #tpu.memory_space<vmem>>) target_semaphore(%234 : memref<!tpu.dma_semaphore, #tpu.memory_space<semaphore_mem>>)
    %c26_i32 = arith.constant 26 : i32
    %235 = arith.addi %0, %c26_i32 : i32
    %236 = arith.index_cast %235 : i32 to index
    %237 = memref.load %arg1[%236] : memref<32xi32, #tpu.memory_space<smem>>
    %c26_i32_104 = arith.constant 26 : i32
    %c26_i32_105 = arith.constant 26 : i32
    %c0_i32_106 = arith.constant 0 : i32
    %238 = tpu.memref_slice %arg2[%237, %c0_i32_106] : memref<65x32xf32, #tpu.memory_space<any>> -> memref<1x32xf32, #tpu.memory_space<any>>
    %239 = tpu.memref_squeeze %238 : memref<1x32xf32, #tpu.memory_space<any>> -> memref<32xf32, #tpu.memory_space<any>>
    %c0_i32_107 = arith.constant 0 : i32
    %240 = tpu.memref_slice %arg4[%c26_i32_104, %c0_i32_107] : memref<32x32xf32, #tpu.memory_space<vmem>> -> memref<1x32xf32, #tpu.memory_space<vmem>>
    %241 = tpu.memref_squeeze %240 : memref<1x32xf32, #tpu.memory_space<vmem>> -> memref<32xf32, #tpu.memory_space<vmem>>
    %242 = tpu.memref_slice %arg5[%c26_i32_105] : memref<32x!tpu.dma_semaphore, #tpu.memory_space<semaphore_mem>> -> memref<1x!tpu.dma_semaphore, #tpu.memory_space<semaphore_mem>>
    %243 = tpu.memref_squeeze %242 : memref<1x!tpu.dma_semaphore, #tpu.memory_space<semaphore_mem>> -> memref<!tpu.dma_semaphore, #tpu.memory_space<semaphore_mem>>
    tpu.enqueue_dma source(%239 : memref<32xf32, #tpu.memory_space<any>>) target(%241 : memref<32xf32, #tpu.memory_space<vmem>>) target_semaphore(%243 : memref<!tpu.dma_semaphore, #tpu.memory_space<semaphore_mem>>)
    %c27_i32 = arith.constant 27 : i32
    %244 = arith.addi %0, %c27_i32 : i32
    %245 = arith.index_cast %244 : i32 to index
    %246 = memref.load %arg1[%245] : memref<32xi32, #tpu.memory_space<smem>>
    %c27_i32_108 = arith.constant 27 : i32
    %c27_i32_109 = arith.constant 27 : i32
    %c0_i32_110 = arith.constant 0 : i32
    %247 = tpu.memref_slice %arg2[%246, %c0_i32_110] : memref<65x32xf32, #tpu.memory_space<any>> -> memref<1x32xf32, #tpu.memory_space<any>>
    %248 = tpu.memref_squeeze %247 : memref<1x32xf32, #tpu.memory_space<any>> -> memref<32xf32, #tpu.memory_space<any>>
    %c0_i32_111 = arith.constant 0 : i32
    %249 = tpu.memref_slice %arg4[%c27_i32_108, %c0_i32_111] : memref<32x32xf32, #tpu.memory_space<vmem>> -> memref<1x32xf32, #tpu.memory_space<vmem>>
    %250 = tpu.memref_squeeze %249 : memref<1x32xf32, #tpu.memory_space<vmem>> -> memref<32xf32, #tpu.memory_space<vmem>>
    %251 = tpu.memref_slice %arg5[%c27_i32_109] : memref<32x!tpu.dma_semaphore, #tpu.memory_space<semaphore_mem>> -> memref<1x!tpu.dma_semaphore, #tpu.memory_space<semaphore_mem>>
    %252 = tpu.memref_squeeze %251 : memref<1x!tpu.dma_semaphore, #tpu.memory_space<semaphore_mem>> -> memref<!tpu.dma_semaphore, #tpu.memory_space<semaphore_mem>>
    tpu.enqueue_dma source(%248 : memref<32xf32, #tpu.memory_space<any>>) target(%250 : memref<32xf32, #tpu.memory_space<vmem>>) target_semaphore(%252 : memref<!tpu.dma_semaphore, #tpu.memory_space<semaphore_mem>>)
    %c28_i32 = arith.constant 28 : i32
    %253 = arith.addi %0, %c28_i32 : i32
    %254 = arith.index_cast %253 : i32 to index
    %255 = memref.load %arg1[%254] : memref<32xi32, #tpu.memory_space<smem>>
    %c28_i32_112 = arith.constant 28 : i32
    %c28_i32_113 = arith.constant 28 : i32
    %c0_i32_114 = arith.constant 0 : i32
    %256 = tpu.memref_slice %arg2[%255, %c0_i32_114] : memref<65x32xf32, #tpu.memory_space<any>> -> memref<1x32xf32, #tpu.memory_space<any>>
    %257 = tpu.memref_squeeze %256 : memref<1x32xf32, #tpu.memory_space<any>> -> memref<32xf32, #tpu.memory_space<any>>
    %c0_i32_115 = arith.constant 0 : i32
    %258 = tpu.memref_slice %arg4[%c28_i32_112, %c0_i32_115] : memref<32x32xf32, #tpu.memory_space<vmem>> -> memref<1x32xf32, #tpu.memory_space<vmem>>
    %259 = tpu.memref_squeeze %258 : memref<1x32xf32, #tpu.memory_space<vmem>> -> memref<32xf32, #tpu.memory_space<vmem>>
    %260 = tpu.memref_slice %arg5[%c28_i32_113] : memref<32x!tpu.dma_semaphore, #tpu.memory_space<semaphore_mem>> -> memref<1x!tpu.dma_semaphore, #tpu.memory_space<semaphore_mem>>
    %261 = tpu.memref_squeeze %260 : memref<1x!tpu.dma_semaphore, #tpu.memory_space<semaphore_mem>> -> memref<!tpu.dma_semaphore, #tpu.memory_space<semaphore_mem>>
    tpu.enqueue_dma source(%257 : memref<32xf32, #tpu.memory_space<any>>) target(%259 : memref<32xf32, #tpu.memory_space<vmem>>) target_semaphore(%261 : memref<!tpu.dma_semaphore, #tpu.memory_space<semaphore_mem>>)
    %c29_i32 = arith.constant 29 : i32
    %262 = arith.addi %0, %c29_i32 : i32
    %263 = arith.index_cast %262 : i32 to index
    %264 = memref.load %arg1[%263] : memref<32xi32, #tpu.memory_space<smem>>
    %c29_i32_116 = arith.constant 29 : i32
    %c29_i32_117 = arith.constant 29 : i32
    %c0_i32_118 = arith.constant 0 : i32
    %265 = tpu.memref_slice %arg2[%264, %c0_i32_118] : memref<65x32xf32, #tpu.memory_space<any>> -> memref<1x32xf32, #tpu.memory_space<any>>
    %266 = tpu.memref_squeeze %265 : memref<1x32xf32, #tpu.memory_space<any>> -> memref<32xf32, #tpu.memory_space<any>>
    %c0_i32_119 = arith.constant 0 : i32
    %267 = tpu.memref_slice %arg4[%c29_i32_116, %c0_i32_119] : memref<32x32xf32, #tpu.memory_space<vmem>> -> memref<1x32xf32, #tpu.memory_space<vmem>>
    %268 = tpu.memref_squeeze %267 : memref<1x32xf32, #tpu.memory_space<vmem>> -> memref<32xf32, #tpu.memory_space<vmem>>
    %269 = tpu.memref_slice %arg5[%c29_i32_117] : memref<32x!tpu.dma_semaphore, #tpu.memory_space<semaphore_mem>> -> memref<1x!tpu.dma_semaphore, #tpu.memory_space<semaphore_mem>>
    %270 = tpu.memref_squeeze %269 : memref<1x!tpu.dma_semaphore, #tpu.memory_space<semaphore_mem>> -> memref<!tpu.dma_semaphore, #tpu.memory_space<semaphore_mem>>
    tpu.enqueue_dma source(%266 : memref<32xf32, #tpu.memory_space<any>>) target(%268 : memref<32xf32, #tpu.memory_space<vmem>>) target_semaphore(%270 : memref<!tpu.dma_semaphore, #tpu.memory_space<semaphore_mem>>)
    %c30_i32 = arith.constant 30 : i32
    %271 = arith.addi %0, %c30_i32 : i32
    %272 = arith.index_cast %271 : i32 to index
    %273 = memref.load %arg1[%272] : memref<32xi32, #tpu.memory_space<smem>>
    %c30_i32_120 = arith.constant 30 : i32
    %c30_i32_121 = arith.constant 30 : i32
    %c0_i32_122 = arith.constant 0 : i32
    %274 = tpu.memref_slice %arg2[%273, %c0_i32_122] : memref<65x32xf32, #tpu.memory_space<any>> -> memref<1x32xf32, #tpu.memory_space<any>>
    %275 = tpu.memref_squeeze %274 : memref<1x32xf32, #tpu.memory_space<any>> -> memref<32xf32, #tpu.memory_space<any>>
    %c0_i32_123 = arith.constant 0 : i32
    %276 = tpu.memref_slice %arg4[%c30_i32_120, %c0_i32_123] : memref<32x32xf32, #tpu.memory_space<vmem>> -> memref<1x32xf32, #tpu.memory_space<vmem>>
    %277 = tpu.memref_squeeze %276 : memref<1x32xf32, #tpu.memory_space<vmem>> -> memref<32xf32, #tpu.memory_space<vmem>>
    %278 = tpu.memref_slice %arg5[%c30_i32_121] : memref<32x!tpu.dma_semaphore, #tpu.memory_space<semaphore_mem>> -> memref<1x!tpu.dma_semaphore, #tpu.memory_space<semaphore_mem>>
    %279 = tpu.memref_squeeze %278 : memref<1x!tpu.dma_semaphore, #tpu.memory_space<semaphore_mem>> -> memref<!tpu.dma_semaphore, #tpu.memory_space<semaphore_mem>>
    tpu.enqueue_dma source(%275 : memref<32xf32, #tpu.memory_space<any>>) target(%277 : memref<32xf32, #tpu.memory_space<vmem>>) target_semaphore(%279 : memref<!tpu.dma_semaphore, #tpu.memory_space<semaphore_mem>>)
    %c31_i32 = arith.constant 31 : i32
    %280 = arith.addi %0, %c31_i32 : i32
    %281 = arith.index_cast %280 : i32 to index
    %282 = memref.load %arg1[%281] : memref<32xi32, #tpu.memory_space<smem>>
    %c31_i32_124 = arith.constant 31 : i32
    %c31_i32_125 = arith.constant 31 : i32
    %c0_i32_126 = arith.constant 0 : i32
    %283 = tpu.memref_slice %arg2[%282, %c0_i32_126] : memref<65x32xf32, #tpu.memory_space<any>> -> memref<1x32xf32, #tpu.memory_space<any>>
    %284 = tpu.memref_squeeze %283 : memref<1x32xf32, #tpu.memory_space<any>> -> memref<32xf32, #tpu.memory_space<any>>
    %c0_i32_127 = arith.constant 0 : i32
    %285 = tpu.memref_slice %arg4[%c31_i32_124, %c0_i32_127] : memref<32x32xf32, #tpu.memory_space<vmem>> -> memref<1x32xf32, #tpu.memory_space<vmem>>
    %286 = tpu.memref_squeeze %285 : memref<1x32xf32, #tpu.memory_space<vmem>> -> memref<32xf32, #tpu.memory_space<vmem>>
    %287 = tpu.memref_slice %arg5[%c31_i32_125] : memref<32x!tpu.dma_semaphore, #tpu.memory_space<semaphore_mem>> -> memref<1x!tpu.dma_semaphore, #tpu.memory_space<semaphore_mem>>
    %288 = tpu.memref_squeeze %287 : memref<1x!tpu.dma_semaphore, #tpu.memory_space<semaphore_mem>> -> memref<!tpu.dma_semaphore, #tpu.memory_space<semaphore_mem>>
    tpu.enqueue_dma source(%284 : memref<32xf32, #tpu.memory_space<any>>) target(%286 : memref<32xf32, #tpu.memory_space<vmem>>) target_semaphore(%288 : memref<!tpu.dma_semaphore, #tpu.memory_space<semaphore_mem>>)
    %c0_i32_128 = arith.constant 0 : i32
    %c0_i32_129 = arith.constant 0 : i32
    %c0_i32_130 = arith.constant 0 : i32
    %289 = tpu.memref_slice %arg2[%3, %c0_i32_130] : memref<65x32xf32, #tpu.memory_space<any>> -> memref<1x32xf32, #tpu.memory_space<any>>
    %290 = tpu.memref_squeeze %289 : memref<1x32xf32, #tpu.memory_space<any>> -> memref<32xf32, #tpu.memory_space<any>>
    %c0_i32_131 = arith.constant 0 : i32
    %291 = tpu.memref_slice %arg4[%c0_i32_128, %c0_i32_131] : memref<32x32xf32, #tpu.memory_space<vmem>> -> memref<1x32xf32, #tpu.memory_space<vmem>>
    %292 = tpu.memref_squeeze %291 : memref<1x32xf32, #tpu.memory_space<vmem>> -> memref<32xf32, #tpu.memory_space<vmem>>
    %293 = tpu.memref_slice %arg5[%c0_i32_129] : memref<32x!tpu.dma_semaphore, #tpu.memory_space<semaphore_mem>> -> memref<1x!tpu.dma_semaphore, #tpu.memory_space<semaphore_mem>>
    %294 = tpu.memref_squeeze %293 : memref<1x!tpu.dma_semaphore, #tpu.memory_space<semaphore_mem>> -> memref<!tpu.dma_semaphore, #tpu.memory_space<semaphore_mem>>
    tpu.wait_dma2 semaphore(%294 : memref<!tpu.dma_semaphore, #tpu.memory_space<semaphore_mem>>) src(%290 : memref<32xf32, #tpu.memory_space<any>>) dst(%292 : memref<32xf32, #tpu.memory_space<vmem>>)
    %c1_i32_132 = arith.constant 1 : i32
    %c1_i32_133 = arith.constant 1 : i32
    %c0_i32_134 = arith.constant 0 : i32
    %295 = tpu.memref_slice %arg2[%12, %c0_i32_134] : memref<65x32xf32, #tpu.memory_space<any>> -> memref<1x32xf32, #tpu.memory_space<any>>
    %296 = tpu.memref_squeeze %295 : memref<1x32xf32, #tpu.memory_space<any>> -> memref<32xf32, #tpu.memory_space<any>>
    %c0_i32_135 = arith.constant 0 : i32
    %297 = tpu.memref_slice %arg4[%c1_i32_132, %c0_i32_135] : memref<32x32xf32, #tpu.memory_space<vmem>> -> memref<1x32xf32, #tpu.memory_space<vmem>>
    %298 = tpu.memref_squeeze %297 : memref<1x32xf32, #tpu.memory_space<vmem>> -> memref<32xf32, #tpu.memory_space<vmem>>
    %299 = tpu.memref_slice %arg5[%c1_i32_133] : memref<32x!tpu.dma_semaphore, #tpu.memory_space<semaphore_mem>> -> memref<1x!tpu.dma_semaphore, #tpu.memory_space<semaphore_mem>>
    %300 = tpu.memref_squeeze %299 : memref<1x!tpu.dma_semaphore, #tpu.memory_space<semaphore_mem>> -> memref<!tpu.dma_semaphore, #tpu.memory_space<semaphore_mem>>
    tpu.wait_dma2 semaphore(%300 : memref<!tpu.dma_semaphore, #tpu.memory_space<semaphore_mem>>) src(%296 : memref<32xf32, #tpu.memory_space<any>>) dst(%298 : memref<32xf32, #tpu.memory_space<vmem>>)
    %c2_i32_136 = arith.constant 2 : i32
    %c2_i32_137 = arith.constant 2 : i32
    %c0_i32_138 = arith.constant 0 : i32
    %301 = tpu.memref_slice %arg2[%21, %c0_i32_138] : memref<65x32xf32, #tpu.memory_space<any>> -> memref<1x32xf32, #tpu.memory_space<any>>
    %302 = tpu.memref_squeeze %301 : memref<1x32xf32, #tpu.memory_space<any>> -> memref<32xf32, #tpu.memory_space<any>>
    %c0_i32_139 = arith.constant 0 : i32
    %303 = tpu.memref_slice %arg4[%c2_i32_136, %c0_i32_139] : memref<32x32xf32, #tpu.memory_space<vmem>> -> memref<1x32xf32, #tpu.memory_space<vmem>>
    %304 = tpu.memref_squeeze %303 : memref<1x32xf32, #tpu.memory_space<vmem>> -> memref<32xf32, #tpu.memory_space<vmem>>
    %305 = tpu.memref_slice %arg5[%c2_i32_137] : memref<32x!tpu.dma_semaphore, #tpu.memory_space<semaphore_mem>> -> memref<1x!tpu.dma_semaphore, #tpu.memory_space<semaphore_mem>>
    %306 = tpu.memref_squeeze %305 : memref<1x!tpu.dma_semaphore, #tpu.memory_space<semaphore_mem>> -> memref<!tpu.dma_semaphore, #tpu.memory_space<semaphore_mem>>
    tpu.wait_dma2 semaphore(%306 : memref<!tpu.dma_semaphore, #tpu.memory_space<semaphore_mem>>) src(%302 : memref<32xf32, #tpu.memory_space<any>>) dst(%304 : memref<32xf32, #tpu.memory_space<vmem>>)
    %c3_i32_140 = arith.constant 3 : i32
    %c3_i32_141 = arith.constant 3 : i32
    %c0_i32_142 = arith.constant 0 : i32
    %307 = tpu.memref_slice %arg2[%30, %c0_i32_142] : memref<65x32xf32, #tpu.memory_space<any>> -> memref<1x32xf32, #tpu.memory_space<any>>
    %308 = tpu.memref_squeeze %307 : memref<1x32xf32, #tpu.memory_space<any>> -> memref<32xf32, #tpu.memory_space<any>>
    %c0_i32_143 = arith.constant 0 : i32
    %309 = tpu.memref_slice %arg4[%c3_i32_140, %c0_i32_143] : memref<32x32xf32, #tpu.memory_space<vmem>> -> memref<1x32xf32, #tpu.memory_space<vmem>>
    %310 = tpu.memref_squeeze %309 : memref<1x32xf32, #tpu.memory_space<vmem>> -> memref<32xf32, #tpu.memory_space<vmem>>
    %311 = tpu.memref_slice %arg5[%c3_i32_141] : memref<32x!tpu.dma_semaphore, #tpu.memory_space<semaphore_mem>> -> memref<1x!tpu.dma_semaphore, #tpu.memory_space<semaphore_mem>>
    %312 = tpu.memref_squeeze %311 : memref<1x!tpu.dma_semaphore, #tpu.memory_space<semaphore_mem>> -> memref<!tpu.dma_semaphore, #tpu.memory_space<semaphore_mem>>
    tpu.wait_dma2 semaphore(%312 : memref<!tpu.dma_semaphore, #tpu.memory_space<semaphore_mem>>) src(%308 : memref<32xf32, #tpu.memory_space<any>>) dst(%310 : memref<32xf32, #tpu.memory_space<vmem>>)
    %c4_i32_144 = arith.constant 4 : i32
    %c4_i32_145 = arith.constant 4 : i32
    %c0_i32_146 = arith.constant 0 : i32
    %313 = tpu.memref_slice %arg2[%39, %c0_i32_146] : memref<65x32xf32, #tpu.memory_space<any>> -> memref<1x32xf32, #tpu.memory_space<any>>
    %314 = tpu.memref_squeeze %313 : memref<1x32xf32, #tpu.memory_space<any>> -> memref<32xf32, #tpu.memory_space<any>>
    %c0_i32_147 = arith.constant 0 : i32
    %315 = tpu.memref_slice %arg4[%c4_i32_144, %c0_i32_147] : memref<32x32xf32, #tpu.memory_space<vmem>> -> memref<1x32xf32, #tpu.memory_space<vmem>>
    %316 = tpu.memref_squeeze %315 : memref<1x32xf32, #tpu.memory_space<vmem>> -> memref<32xf32, #tpu.memory_space<vmem>>
    %317 = tpu.memref_slice %arg5[%c4_i32_145] : memref<32x!tpu.dma_semaphore, #tpu.memory_space<semaphore_mem>> -> memref<1x!tpu.dma_semaphore, #tpu.memory_space<semaphore_mem>>
    %318 = tpu.memref_squeeze %317 : memref<1x!tpu.dma_semaphore, #tpu.memory_space<semaphore_mem>> -> memref<!tpu.dma_semaphore, #tpu.memory_space<semaphore_mem>>
    tpu.wait_dma2 semaphore(%318 : memref<!tpu.dma_semaphore, #tpu.memory_space<semaphore_mem>>) src(%314 : memref<32xf32, #tpu.memory_space<any>>) dst(%316 : memref<32xf32, #tpu.memory_space<vmem>>)
    %c5_i32_148 = arith.constant 5 : i32
    %c5_i32_149 = arith.constant 5 : i32
    %c0_i32_150 = arith.constant 0 : i32
    %319 = tpu.memref_slice %arg2[%48, %c0_i32_150] : memref<65x32xf32, #tpu.memory_space<any>> -> memref<1x32xf32, #tpu.memory_space<any>>
    %320 = tpu.memref_squeeze %319 : memref<1x32xf32, #tpu.memory_space<any>> -> memref<32xf32, #tpu.memory_space<any>>
    %c0_i32_151 = arith.constant 0 : i32
    %321 = tpu.memref_slice %arg4[%c5_i32_148, %c0_i32_151] : memref<32x32xf32, #tpu.memory_space<vmem>> -> memref<1x32xf32, #tpu.memory_space<vmem>>
    %322 = tpu.memref_squeeze %321 : memref<1x32xf32, #tpu.memory_space<vmem>> -> memref<32xf32, #tpu.memory_space<vmem>>
    %323 = tpu.memref_slice %arg5[%c5_i32_149] : memref<32x!tpu.dma_semaphore, #tpu.memory_space<semaphore_mem>> -> memref<1x!tpu.dma_semaphore, #tpu.memory_space<semaphore_mem>>
    %324 = tpu.memref_squeeze %323 : memref<1x!tpu.dma_semaphore, #tpu.memory_space<semaphore_mem>> -> memref<!tpu.dma_semaphore, #tpu.memory_space<semaphore_mem>>
    tpu.wait_dma2 semaphore(%324 : memref<!tpu.dma_semaphore, #tpu.memory_space<semaphore_mem>>) src(%320 : memref<32xf32, #tpu.memory_space<any>>) dst(%322 : memref<32xf32, #tpu.memory_space<vmem>>)
    %c6_i32_152 = arith.constant 6 : i32
    %c6_i32_153 = arith.constant 6 : i32
    %c0_i32_154 = arith.constant 0 : i32
    %325 = tpu.memref_slice %arg2[%57, %c0_i32_154] : memref<65x32xf32, #tpu.memory_space<any>> -> memref<1x32xf32, #tpu.memory_space<any>>
    %326 = tpu.memref_squeeze %325 : memref<1x32xf32, #tpu.memory_space<any>> -> memref<32xf32, #tpu.memory_space<any>>
    %c0_i32_155 = arith.constant 0 : i32
    %327 = tpu.memref_slice %arg4[%c6_i32_152, %c0_i32_155] : memref<32x32xf32, #tpu.memory_space<vmem>> -> memref<1x32xf32, #tpu.memory_space<vmem>>
    %328 = tpu.memref_squeeze %327 : memref<1x32xf32, #tpu.memory_space<vmem>> -> memref<32xf32, #tpu.memory_space<vmem>>
    %329 = tpu.memref_slice %arg5[%c6_i32_153] : memref<32x!tpu.dma_semaphore, #tpu.memory_space<semaphore_mem>> -> memref<1x!tpu.dma_semaphore, #tpu.memory_space<semaphore_mem>>
    %330 = tpu.memref_squeeze %329 : memref<1x!tpu.dma_semaphore, #tpu.memory_space<semaphore_mem>> -> memref<!tpu.dma_semaphore, #tpu.memory_space<semaphore_mem>>
    tpu.wait_dma2 semaphore(%330 : memref<!tpu.dma_semaphore, #tpu.memory_space<semaphore_mem>>) src(%326 : memref<32xf32, #tpu.memory_space<any>>) dst(%328 : memref<32xf32, #tpu.memory_space<vmem>>)
    %c7_i32_156 = arith.constant 7 : i32
    %c7_i32_157 = arith.constant 7 : i32
    %c0_i32_158 = arith.constant 0 : i32
    %331 = tpu.memref_slice %arg2[%66, %c0_i32_158] : memref<65x32xf32, #tpu.memory_space<any>> -> memref<1x32xf32, #tpu.memory_space<any>>
    %332 = tpu.memref_squeeze %331 : memref<1x32xf32, #tpu.memory_space<any>> -> memref<32xf32, #tpu.memory_space<any>>
    %c0_i32_159 = arith.constant 0 : i32
    %333 = tpu.memref_slice %arg4[%c7_i32_156, %c0_i32_159] : memref<32x32xf32, #tpu.memory_space<vmem>> -> memref<1x32xf32, #tpu.memory_space<vmem>>
    %334 = tpu.memref_squeeze %333 : memref<1x32xf32, #tpu.memory_space<vmem>> -> memref<32xf32, #tpu.memory_space<vmem>>
    %335 = tpu.memref_slice %arg5[%c7_i32_157] : memref<32x!tpu.dma_semaphore, #tpu.memory_space<semaphore_mem>> -> memref<1x!tpu.dma_semaphore, #tpu.memory_space<semaphore_mem>>
    %336 = tpu.memref_squeeze %335 : memref<1x!tpu.dma_semaphore, #tpu.memory_space<semaphore_mem>> -> memref<!tpu.dma_semaphore, #tpu.memory_space<semaphore_mem>>
    tpu.wait_dma2 semaphore(%336 : memref<!tpu.dma_semaphore, #tpu.memory_space<semaphore_mem>>) src(%332 : memref<32xf32, #tpu.memory_space<any>>) dst(%334 : memref<32xf32, #tpu.memory_space<vmem>>)
    %c8_i32_160 = arith.constant 8 : i32
    %c8_i32_161 = arith.constant 8 : i32
    %c0_i32_162 = arith.constant 0 : i32
    %337 = tpu.memref_slice %arg2[%75, %c0_i32_162] : memref<65x32xf32, #tpu.memory_space<any>> -> memref<1x32xf32, #tpu.memory_space<any>>
    %338 = tpu.memref_squeeze %337 : memref<1x32xf32, #tpu.memory_space<any>> -> memref<32xf32, #tpu.memory_space<any>>
    %c0_i32_163 = arith.constant 0 : i32
    %339 = tpu.memref_slice %arg4[%c8_i32_160, %c0_i32_163] : memref<32x32xf32, #tpu.memory_space<vmem>> -> memref<1x32xf32, #tpu.memory_space<vmem>>
    %340 = tpu.memref_squeeze %339 : memref<1x32xf32, #tpu.memory_space<vmem>> -> memref<32xf32, #tpu.memory_space<vmem>>
    %341 = tpu.memref_slice %arg5[%c8_i32_161] : memref<32x!tpu.dma_semaphore, #tpu.memory_space<semaphore_mem>> -> memref<1x!tpu.dma_semaphore, #tpu.memory_space<semaphore_mem>>
    %342 = tpu.memref_squeeze %341 : memref<1x!tpu.dma_semaphore, #tpu.memory_space<semaphore_mem>> -> memref<!tpu.dma_semaphore, #tpu.memory_space<semaphore_mem>>
    tpu.wait_dma2 semaphore(%342 : memref<!tpu.dma_semaphore, #tpu.memory_space<semaphore_mem>>) src(%338 : memref<32xf32, #tpu.memory_space<any>>) dst(%340 : memref<32xf32, #tpu.memory_space<vmem>>)
    %c9_i32_164 = arith.constant 9 : i32
    %c9_i32_165 = arith.constant 9 : i32
    %c0_i32_166 = arith.constant 0 : i32
    %343 = tpu.memref_slice %arg2[%84, %c0_i32_166] : memref<65x32xf32, #tpu.memory_space<any>> -> memref<1x32xf32, #tpu.memory_space<any>>
    %344 = tpu.memref_squeeze %343 : memref<1x32xf32, #tpu.memory_space<any>> -> memref<32xf32, #tpu.memory_space<any>>
    %c0_i32_167 = arith.constant 0 : i32
    %345 = tpu.memref_slice %arg4[%c9_i32_164, %c0_i32_167] : memref<32x32xf32, #tpu.memory_space<vmem>> -> memref<1x32xf32, #tpu.memory_space<vmem>>
    %346 = tpu.memref_squeeze %345 : memref<1x32xf32, #tpu.memory_space<vmem>> -> memref<32xf32, #tpu.memory_space<vmem>>
    %347 = tpu.memref_slice %arg5[%c9_i32_165] : memref<32x!tpu.dma_semaphore, #tpu.memory_space<semaphore_mem>> -> memref<1x!tpu.dma_semaphore, #tpu.memory_space<semaphore_mem>>
    %348 = tpu.memref_squeeze %347 : memref<1x!tpu.dma_semaphore, #tpu.memory_space<semaphore_mem>> -> memref<!tpu.dma_semaphore, #tpu.memory_space<semaphore_mem>>
    tpu.wait_dma2 semaphore(%348 : memref<!tpu.dma_semaphore, #tpu.memory_space<semaphore_mem>>) src(%344 : memref<32xf32, #tpu.memory_space<any>>) dst(%346 : memref<32xf32, #tpu.memory_space<vmem>>)
    %c10_i32_168 = arith.constant 10 : i32
    %c10_i32_169 = arith.constant 10 : i32
    %c0_i32_170 = arith.constant 0 : i32
    %349 = tpu.memref_slice %arg2[%93, %c0_i32_170] : memref<65x32xf32, #tpu.memory_space<any>> -> memref<1x32xf32, #tpu.memory_space<any>>
    %350 = tpu.memref_squeeze %349 : memref<1x32xf32, #tpu.memory_space<any>> -> memref<32xf32, #tpu.memory_space<any>>
    %c0_i32_171 = arith.constant 0 : i32
    %351 = tpu.memref_slice %arg4[%c10_i32_168, %c0_i32_171] : memref<32x32xf32, #tpu.memory_space<vmem>> -> memref<1x32xf32, #tpu.memory_space<vmem>>
    %352 = tpu.memref_squeeze %351 : memref<1x32xf32, #tpu.memory_space<vmem>> -> memref<32xf32, #tpu.memory_space<vmem>>
    %353 = tpu.memref_slice %arg5[%c10_i32_169] : memref<32x!tpu.dma_semaphore, #tpu.memory_space<semaphore_mem>> -> memref<1x!tpu.dma_semaphore, #tpu.memory_space<semaphore_mem>>
    %354 = tpu.memref_squeeze %353 : memref<1x!tpu.dma_semaphore, #tpu.memory_space<semaphore_mem>> -> memref<!tpu.dma_semaphore, #tpu.memory_space<semaphore_mem>>
    tpu.wait_dma2 semaphore(%354 : memref<!tpu.dma_semaphore, #tpu.memory_space<semaphore_mem>>) src(%350 : memref<32xf32, #tpu.memory_space<any>>) dst(%352 : memref<32xf32, #tpu.memory_space<vmem>>)
    %c11_i32_172 = arith.constant 11 : i32
    %c11_i32_173 = arith.constant 11 : i32
    %c0_i32_174 = arith.constant 0 : i32
    %355 = tpu.memref_slice %arg2[%102, %c0_i32_174] : memref<65x32xf32, #tpu.memory_space<any>> -> memref<1x32xf32, #tpu.memory_space<any>>
    %356 = tpu.memref_squeeze %355 : memref<1x32xf32, #tpu.memory_space<any>> -> memref<32xf32, #tpu.memory_space<any>>
    %c0_i32_175 = arith.constant 0 : i32
    %357 = tpu.memref_slice %arg4[%c11_i32_172, %c0_i32_175] : memref<32x32xf32, #tpu.memory_space<vmem>> -> memref<1x32xf32, #tpu.memory_space<vmem>>
    %358 = tpu.memref_squeeze %357 : memref<1x32xf32, #tpu.memory_space<vmem>> -> memref<32xf32, #tpu.memory_space<vmem>>
    %359 = tpu.memref_slice %arg5[%c11_i32_173] : memref<32x!tpu.dma_semaphore, #tpu.memory_space<semaphore_mem>> -> memref<1x!tpu.dma_semaphore, #tpu.memory_space<semaphore_mem>>
    %360 = tpu.memref_squeeze %359 : memref<1x!tpu.dma_semaphore, #tpu.memory_space<semaphore_mem>> -> memref<!tpu.dma_semaphore, #tpu.memory_space<semaphore_mem>>
    tpu.wait_dma2 semaphore(%360 : memref<!tpu.dma_semaphore, #tpu.memory_space<semaphore_mem>>) src(%356 : memref<32xf32, #tpu.memory_space<any>>) dst(%358 : memref<32xf32, #tpu.memory_space<vmem>>)
    %c12_i32_176 = arith.constant 12 : i32
    %c12_i32_177 = arith.constant 12 : i32
    %c0_i32_178 = arith.constant 0 : i32
    %361 = tpu.memref_slice %arg2[%111, %c0_i32_178] : memref<65x32xf32, #tpu.memory_space<any>> -> memref<1x32xf32, #tpu.memory_space<any>>
    %362 = tpu.memref_squeeze %361 : memref<1x32xf32, #tpu.memory_space<any>> -> memref<32xf32, #tpu.memory_space<any>>
    %c0_i32_179 = arith.constant 0 : i32
    %363 = tpu.memref_slice %arg4[%c12_i32_176, %c0_i32_179] : memref<32x32xf32, #tpu.memory_space<vmem>> -> memref<1x32xf32, #tpu.memory_space<vmem>>
    %364 = tpu.memref_squeeze %363 : memref<1x32xf32, #tpu.memory_space<vmem>> -> memref<32xf32, #tpu.memory_space<vmem>>
    %365 = tpu.memref_slice %arg5[%c12_i32_177] : memref<32x!tpu.dma_semaphore, #tpu.memory_space<semaphore_mem>> -> memref<1x!tpu.dma_semaphore, #tpu.memory_space<semaphore_mem>>
    %366 = tpu.memref_squeeze %365 : memref<1x!tpu.dma_semaphore, #tpu.memory_space<semaphore_mem>> -> memref<!tpu.dma_semaphore, #tpu.memory_space<semaphore_mem>>
    tpu.wait_dma2 semaphore(%366 : memref<!tpu.dma_semaphore, #tpu.memory_space<semaphore_mem>>) src(%362 : memref<32xf32, #tpu.memory_space<any>>) dst(%364 : memref<32xf32, #tpu.memory_space<vmem>>)
    %c13_i32_180 = arith.constant 13 : i32
    %c13_i32_181 = arith.constant 13 : i32
    %c0_i32_182 = arith.constant 0 : i32
    %367 = tpu.memref_slice %arg2[%120, %c0_i32_182] : memref<65x32xf32, #tpu.memory_space<any>> -> memref<1x32xf32, #tpu.memory_space<any>>
    %368 = tpu.memref_squeeze %367 : memref<1x32xf32, #tpu.memory_space<any>> -> memref<32xf32, #tpu.memory_space<any>>
    %c0_i32_183 = arith.constant 0 : i32
    %369 = tpu.memref_slice %arg4[%c13_i32_180, %c0_i32_183] : memref<32x32xf32, #tpu.memory_space<vmem>> -> memref<1x32xf32, #tpu.memory_space<vmem>>
    %370 = tpu.memref_squeeze %369 : memref<1x32xf32, #tpu.memory_space<vmem>> -> memref<32xf32, #tpu.memory_space<vmem>>
    %371 = tpu.memref_slice %arg5[%c13_i32_181] : memref<32x!tpu.dma_semaphore, #tpu.memory_space<semaphore_mem>> -> memref<1x!tpu.dma_semaphore, #tpu.memory_space<semaphore_mem>>
    %372 = tpu.memref_squeeze %371 : memref<1x!tpu.dma_semaphore, #tpu.memory_space<semaphore_mem>> -> memref<!tpu.dma_semaphore, #tpu.memory_space<semaphore_mem>>
    tpu.wait_dma2 semaphore(%372 : memref<!tpu.dma_semaphore, #tpu.memory_space<semaphore_mem>>) src(%368 : memref<32xf32, #tpu.memory_space<any>>) dst(%370 : memref<32xf32, #tpu.memory_space<vmem>>)
    %c14_i32_184 = arith.constant 14 : i32
    %c14_i32_185 = arith.constant 14 : i32
    %c0_i32_186 = arith.constant 0 : i32
    %373 = tpu.memref_slice %arg2[%129, %c0_i32_186] : memref<65x32xf32, #tpu.memory_space<any>> -> memref<1x32xf32, #tpu.memory_space<any>>
    %374 = tpu.memref_squeeze %373 : memref<1x32xf32, #tpu.memory_space<any>> -> memref<32xf32, #tpu.memory_space<any>>
    %c0_i32_187 = arith.constant 0 : i32
    %375 = tpu.memref_slice %arg4[%c14_i32_184, %c0_i32_187] : memref<32x32xf32, #tpu.memory_space<vmem>> -> memref<1x32xf32, #tpu.memory_space<vmem>>
    %376 = tpu.memref_squeeze %375 : memref<1x32xf32, #tpu.memory_space<vmem>> -> memref<32xf32, #tpu.memory_space<vmem>>
    %377 = tpu.memref_slice %arg5[%c14_i32_185] : memref<32x!tpu.dma_semaphore, #tpu.memory_space<semaphore_mem>> -> memref<1x!tpu.dma_semaphore, #tpu.memory_space<semaphore_mem>>
    %378 = tpu.memref_squeeze %377 : memref<1x!tpu.dma_semaphore, #tpu.memory_space<semaphore_mem>> -> memref<!tpu.dma_semaphore, #tpu.memory_space<semaphore_mem>>
    tpu.wait_dma2 semaphore(%378 : memref<!tpu.dma_semaphore, #tpu.memory_space<semaphore_mem>>) src(%374 : memref<32xf32, #tpu.memory_space<any>>) dst(%376 : memref<32xf32, #tpu.memory_space<vmem>>)
    %c15_i32_188 = arith.constant 15 : i32
    %c15_i32_189 = arith.constant 15 : i32
    %c0_i32_190 = arith.constant 0 : i32
    %379 = tpu.memref_slice %arg2[%138, %c0_i32_190] : memref<65x32xf32, #tpu.memory_space<any>> -> memref<1x32xf32, #tpu.memory_space<any>>
    %380 = tpu.memref_squeeze %379 : memref<1x32xf32, #tpu.memory_space<any>> -> memref<32xf32, #tpu.memory_space<any>>
    %c0_i32_191 = arith.constant 0 : i32
    %381 = tpu.memref_slice %arg4[%c15_i32_188, %c0_i32_191] : memref<32x32xf32, #tpu.memory_space<vmem>> -> memref<1x32xf32, #tpu.memory_space<vmem>>
    %382 = tpu.memref_squeeze %381 : memref<1x32xf32, #tpu.memory_space<vmem>> -> memref<32xf32, #tpu.memory_space<vmem>>
    %383 = tpu.memref_slice %arg5[%c15_i32_189] : memref<32x!tpu.dma_semaphore, #tpu.memory_space<semaphore_mem>> -> memref<1x!tpu.dma_semaphore, #tpu.memory_space<semaphore_mem>>
    %384 = tpu.memref_squeeze %383 : memref<1x!tpu.dma_semaphore, #tpu.memory_space<semaphore_mem>> -> memref<!tpu.dma_semaphore, #tpu.memory_space<semaphore_mem>>
    tpu.wait_dma2 semaphore(%384 : memref<!tpu.dma_semaphore, #tpu.memory_space<semaphore_mem>>) src(%380 : memref<32xf32, #tpu.memory_space<any>>) dst(%382 : memref<32xf32, #tpu.memory_space<vmem>>)
    %c16_i32_192 = arith.constant 16 : i32
    %c16_i32_193 = arith.constant 16 : i32
    %c0_i32_194 = arith.constant 0 : i32
    %385 = tpu.memref_slice %arg2[%147, %c0_i32_194] : memref<65x32xf32, #tpu.memory_space<any>> -> memref<1x32xf32, #tpu.memory_space<any>>
    %386 = tpu.memref_squeeze %385 : memref<1x32xf32, #tpu.memory_space<any>> -> memref<32xf32, #tpu.memory_space<any>>
    %c0_i32_195 = arith.constant 0 : i32
    %387 = tpu.memref_slice %arg4[%c16_i32_192, %c0_i32_195] : memref<32x32xf32, #tpu.memory_space<vmem>> -> memref<1x32xf32, #tpu.memory_space<vmem>>
    %388 = tpu.memref_squeeze %387 : memref<1x32xf32, #tpu.memory_space<vmem>> -> memref<32xf32, #tpu.memory_space<vmem>>
    %389 = tpu.memref_slice %arg5[%c16_i32_193] : memref<32x!tpu.dma_semaphore, #tpu.memory_space<semaphore_mem>> -> memref<1x!tpu.dma_semaphore, #tpu.memory_space<semaphore_mem>>
    %390 = tpu.memref_squeeze %389 : memref<1x!tpu.dma_semaphore, #tpu.memory_space<semaphore_mem>> -> memref<!tpu.dma_semaphore, #tpu.memory_space<semaphore_mem>>
    tpu.wait_dma2 semaphore(%390 : memref<!tpu.dma_semaphore, #tpu.memory_space<semaphore_mem>>) src(%386 : memref<32xf32, #tpu.memory_space<any>>) dst(%388 : memref<32xf32, #tpu.memory_space<vmem>>)
    %c17_i32_196 = arith.constant 17 : i32
    %c17_i32_197 = arith.constant 17 : i32
    %c0_i32_198 = arith.constant 0 : i32
    %391 = tpu.memref_slice %arg2[%156, %c0_i32_198] : memref<65x32xf32, #tpu.memory_space<any>> -> memref<1x32xf32, #tpu.memory_space<any>>
    %392 = tpu.memref_squeeze %391 : memref<1x32xf32, #tpu.memory_space<any>> -> memref<32xf32, #tpu.memory_space<any>>
    %c0_i32_199 = arith.constant 0 : i32
    %393 = tpu.memref_slice %arg4[%c17_i32_196, %c0_i32_199] : memref<32x32xf32, #tpu.memory_space<vmem>> -> memref<1x32xf32, #tpu.memory_space<vmem>>
    %394 = tpu.memref_squeeze %393 : memref<1x32xf32, #tpu.memory_space<vmem>> -> memref<32xf32, #tpu.memory_space<vmem>>
    %395 = tpu.memref_slice %arg5[%c17_i32_197] : memref<32x!tpu.dma_semaphore, #tpu.memory_space<semaphore_mem>> -> memref<1x!tpu.dma_semaphore, #tpu.memory_space<semaphore_mem>>
    %396 = tpu.memref_squeeze %395 : memref<1x!tpu.dma_semaphore, #tpu.memory_space<semaphore_mem>> -> memref<!tpu.dma_semaphore, #tpu.memory_space<semaphore_mem>>
    tpu.wait_dma2 semaphore(%396 : memref<!tpu.dma_semaphore, #tpu.memory_space<semaphore_mem>>) src(%392 : memref<32xf32, #tpu.memory_space<any>>) dst(%394 : memref<32xf32, #tpu.memory_space<vmem>>)
    %c18_i32_200 = arith.constant 18 : i32
    %c18_i32_201 = arith.constant 18 : i32
    %c0_i32_202 = arith.constant 0 : i32
    %397 = tpu.memref_slice %arg2[%165, %c0_i32_202] : memref<65x32xf32, #tpu.memory_space<any>> -> memref<1x32xf32, #tpu.memory_space<any>>
    %398 = tpu.memref_squeeze %397 : memref<1x32xf32, #tpu.memory_space<any>> -> memref<32xf32, #tpu.memory_space<any>>
    %c0_i32_203 = arith.constant 0 : i32
    %399 = tpu.memref_slice %arg4[%c18_i32_200, %c0_i32_203] : memref<32x32xf32, #tpu.memory_space<vmem>> -> memref<1x32xf32, #tpu.memory_space<vmem>>
    %400 = tpu.memref_squeeze %399 : memref<1x32xf32, #tpu.memory_space<vmem>> -> memref<32xf32, #tpu.memory_space<vmem>>
    %401 = tpu.memref_slice %arg5[%c18_i32_201] : memref<32x!tpu.dma_semaphore, #tpu.memory_space<semaphore_mem>> -> memref<1x!tpu.dma_semaphore, #tpu.memory_space<semaphore_mem>>
    %402 = tpu.memref_squeeze %401 : memref<1x!tpu.dma_semaphore, #tpu.memory_space<semaphore_mem>> -> memref<!tpu.dma_semaphore, #tpu.memory_space<semaphore_mem>>
    tpu.wait_dma2 semaphore(%402 : memref<!tpu.dma_semaphore, #tpu.memory_space<semaphore_mem>>) src(%398 : memref<32xf32, #tpu.memory_space<any>>) dst(%400 : memref<32xf32, #tpu.memory_space<vmem>>)
    %c19_i32_204 = arith.constant 19 : i32
    %c19_i32_205 = arith.constant 19 : i32
    %c0_i32_206 = arith.constant 0 : i32
    %403 = tpu.memref_slice %arg2[%174, %c0_i32_206] : memref<65x32xf32, #tpu.memory_space<any>> -> memref<1x32xf32, #tpu.memory_space<any>>
    %404 = tpu.memref_squeeze %403 : memref<1x32xf32, #tpu.memory_space<any>> -> memref<32xf32, #tpu.memory_space<any>>
    %c0_i32_207 = arith.constant 0 : i32
    %405 = tpu.memref_slice %arg4[%c19_i32_204, %c0_i32_207] : memref<32x32xf32, #tpu.memory_space<vmem>> -> memref<1x32xf32, #tpu.memory_space<vmem>>
    %406 = tpu.memref_squeeze %405 : memref<1x32xf32, #tpu.memory_space<vmem>> -> memref<32xf32, #tpu.memory_space<vmem>>
    %407 = tpu.memref_slice %arg5[%c19_i32_205] : memref<32x!tpu.dma_semaphore, #tpu.memory_space<semaphore_mem>> -> memref<1x!tpu.dma_semaphore, #tpu.memory_space<semaphore_mem>>
    %408 = tpu.memref_squeeze %407 : memref<1x!tpu.dma_semaphore, #tpu.memory_space<semaphore_mem>> -> memref<!tpu.dma_semaphore, #tpu.memory_space<semaphore_mem>>
    tpu.wait_dma2 semaphore(%408 : memref<!tpu.dma_semaphore, #tpu.memory_space<semaphore_mem>>) src(%404 : memref<32xf32, #tpu.memory_space<any>>) dst(%406 : memref<32xf32, #tpu.memory_space<vmem>>)
    %c20_i32_208 = arith.constant 20 : i32
    %c20_i32_209 = arith.constant 20 : i32
    %c0_i32_210 = arith.constant 0 : i32
    %409 = tpu.memref_slice %arg2[%183, %c0_i32_210] : memref<65x32xf32, #tpu.memory_space<any>> -> memref<1x32xf32, #tpu.memory_space<any>>
    %410 = tpu.memref_squeeze %409 : memref<1x32xf32, #tpu.memory_space<any>> -> memref<32xf32, #tpu.memory_space<any>>
    %c0_i32_211 = arith.constant 0 : i32
    %411 = tpu.memref_slice %arg4[%c20_i32_208, %c0_i32_211] : memref<32x32xf32, #tpu.memory_space<vmem>> -> memref<1x32xf32, #tpu.memory_space<vmem>>
    %412 = tpu.memref_squeeze %411 : memref<1x32xf32, #tpu.memory_space<vmem>> -> memref<32xf32, #tpu.memory_space<vmem>>
    %413 = tpu.memref_slice %arg5[%c20_i32_209] : memref<32x!tpu.dma_semaphore, #tpu.memory_space<semaphore_mem>> -> memref<1x!tpu.dma_semaphore, #tpu.memory_space<semaphore_mem>>
    %414 = tpu.memref_squeeze %413 : memref<1x!tpu.dma_semaphore, #tpu.memory_space<semaphore_mem>> -> memref<!tpu.dma_semaphore, #tpu.memory_space<semaphore_mem>>
    tpu.wait_dma2 semaphore(%414 : memref<!tpu.dma_semaphore, #tpu.memory_space<semaphore_mem>>) src(%410 : memref<32xf32, #tpu.memory_space<any>>) dst(%412 : memref<32xf32, #tpu.memory_space<vmem>>)
    %c21_i32_212 = arith.constant 21 : i32
    %c21_i32_213 = arith.constant 21 : i32
    %c0_i32_214 = arith.constant 0 : i32
    %415 = tpu.memref_slice %arg2[%192, %c0_i32_214] : memref<65x32xf32, #tpu.memory_space<any>> -> memref<1x32xf32, #tpu.memory_space<any>>
    %416 = tpu.memref_squeeze %415 : memref<1x32xf32, #tpu.memory_space<any>> -> memref<32xf32, #tpu.memory_space<any>>
    %c0_i32_215 = arith.constant 0 : i32
    %417 = tpu.memref_slice %arg4[%c21_i32_212, %c0_i32_215] : memref<32x32xf32, #tpu.memory_space<vmem>> -> memref<1x32xf32, #tpu.memory_space<vmem>>
    %418 = tpu.memref_squeeze %417 : memref<1x32xf32, #tpu.memory_space<vmem>> -> memref<32xf32, #tpu.memory_space<vmem>>
    %419 = tpu.memref_slice %arg5[%c21_i32_213] : memref<32x!tpu.dma_semaphore, #tpu.memory_space<semaphore_mem>> -> memref<1x!tpu.dma_semaphore, #tpu.memory_space<semaphore_mem>>
    %420 = tpu.memref_squeeze %419 : memref<1x!tpu.dma_semaphore, #tpu.memory_space<semaphore_mem>> -> memref<!tpu.dma_semaphore, #tpu.memory_space<semaphore_mem>>
    tpu.wait_dma2 semaphore(%420 : memref<!tpu.dma_semaphore, #tpu.memory_space<semaphore_mem>>) src(%416 : memref<32xf32, #tpu.memory_space<any>>) dst(%418 : memref<32xf32, #tpu.memory_space<vmem>>)
    %c22_i32_216 = arith.constant 22 : i32
    %c22_i32_217 = arith.constant 22 : i32
    %c0_i32_218 = arith.constant 0 : i32
    %421 = tpu.memref_slice %arg2[%201, %c0_i32_218] : memref<65x32xf32, #tpu.memory_space<any>> -> memref<1x32xf32, #tpu.memory_space<any>>
    %422 = tpu.memref_squeeze %421 : memref<1x32xf32, #tpu.memory_space<any>> -> memref<32xf32, #tpu.memory_space<any>>
    %c0_i32_219 = arith.constant 0 : i32
    %423 = tpu.memref_slice %arg4[%c22_i32_216, %c0_i32_219] : memref<32x32xf32, #tpu.memory_space<vmem>> -> memref<1x32xf32, #tpu.memory_space<vmem>>
    %424 = tpu.memref_squeeze %423 : memref<1x32xf32, #tpu.memory_space<vmem>> -> memref<32xf32, #tpu.memory_space<vmem>>
    %425 = tpu.memref_slice %arg5[%c22_i32_217] : memref<32x!tpu.dma_semaphore, #tpu.memory_space<semaphore_mem>> -> memref<1x!tpu.dma_semaphore, #tpu.memory_space<semaphore_mem>>
    %426 = tpu.memref_squeeze %425 : memref<1x!tpu.dma_semaphore, #tpu.memory_space<semaphore_mem>> -> memref<!tpu.dma_semaphore, #tpu.memory_space<semaphore_mem>>
    tpu.wait_dma2 semaphore(%426 : memref<!tpu.dma_semaphore, #tpu.memory_space<semaphore_mem>>) src(%422 : memref<32xf32, #tpu.memory_space<any>>) dst(%424 : memref<32xf32, #tpu.memory_space<vmem>>)
    %c23_i32_220 = arith.constant 23 : i32
    %c23_i32_221 = arith.constant 23 : i32
    %c0_i32_222 = arith.constant 0 : i32
    %427 = tpu.memref_slice %arg2[%210, %c0_i32_222] : memref<65x32xf32, #tpu.memory_space<any>> -> memref<1x32xf32, #tpu.memory_space<any>>
    %428 = tpu.memref_squeeze %427 : memref<1x32xf32, #tpu.memory_space<any>> -> memref<32xf32, #tpu.memory_space<any>>
    %c0_i32_223 = arith.constant 0 : i32
    %429 = tpu.memref_slice %arg4[%c23_i32_220, %c0_i32_223] : memref<32x32xf32, #tpu.memory_space<vmem>> -> memref<1x32xf32, #tpu.memory_space<vmem>>
    %430 = tpu.memref_squeeze %429 : memref<1x32xf32, #tpu.memory_space<vmem>> -> memref<32xf32, #tpu.memory_space<vmem>>
    %431 = tpu.memref_slice %arg5[%c23_i32_221] : memref<32x!tpu.dma_semaphore, #tpu.memory_space<semaphore_mem>> -> memref<1x!tpu.dma_semaphore, #tpu.memory_space<semaphore_mem>>
    %432 = tpu.memref_squeeze %431 : memref<1x!tpu.dma_semaphore, #tpu.memory_space<semaphore_mem>> -> memref<!tpu.dma_semaphore, #tpu.memory_space<semaphore_mem>>
    tpu.wait_dma2 semaphore(%432 : memref<!tpu.dma_semaphore, #tpu.memory_space<semaphore_mem>>) src(%428 : memref<32xf32, #tpu.memory_space<any>>) dst(%430 : memref<32xf32, #tpu.memory_space<vmem>>)
    %c24_i32_224 = arith.constant 24 : i32
    %c24_i32_225 = arith.constant 24 : i32
    %c0_i32_226 = arith.constant 0 : i32
    %433 = tpu.memref_slice %arg2[%219, %c0_i32_226] : memref<65x32xf32, #tpu.memory_space<any>> -> memref<1x32xf32, #tpu.memory_space<any>>
    %434 = tpu.memref_squeeze %433 : memref<1x32xf32, #tpu.memory_space<any>> -> memref<32xf32, #tpu.memory_space<any>>
    %c0_i32_227 = arith.constant 0 : i32
    %435 = tpu.memref_slice %arg4[%c24_i32_224, %c0_i32_227] : memref<32x32xf32, #tpu.memory_space<vmem>> -> memref<1x32xf32, #tpu.memory_space<vmem>>
    %436 = tpu.memref_squeeze %435 : memref<1x32xf32, #tpu.memory_space<vmem>> -> memref<32xf32, #tpu.memory_space<vmem>>
    %437 = tpu.memref_slice %arg5[%c24_i32_225] : memref<32x!tpu.dma_semaphore, #tpu.memory_space<semaphore_mem>> -> memref<1x!tpu.dma_semaphore, #tpu.memory_space<semaphore_mem>>
    %438 = tpu.memref_squeeze %437 : memref<1x!tpu.dma_semaphore, #tpu.memory_space<semaphore_mem>> -> memref<!tpu.dma_semaphore, #tpu.memory_space<semaphore_mem>>
    tpu.wait_dma2 semaphore(%438 : memref<!tpu.dma_semaphore, #tpu.memory_space<semaphore_mem>>) src(%434 : memref<32xf32, #tpu.memory_space<any>>) dst(%436 : memref<32xf32, #tpu.memory_space<vmem>>)
    %c25_i32_228 = arith.constant 25 : i32
    %c25_i32_229 = arith.constant 25 : i32
    %c0_i32_230 = arith.constant 0 : i32
    %439 = tpu.memref_slice %arg2[%228, %c0_i32_230] : memref<65x32xf32, #tpu.memory_space<any>> -> memref<1x32xf32, #tpu.memory_space<any>>
    %440 = tpu.memref_squeeze %439 : memref<1x32xf32, #tpu.memory_space<any>> -> memref<32xf32, #tpu.memory_space<any>>
    %c0_i32_231 = arith.constant 0 : i32
    %441 = tpu.memref_slice %arg4[%c25_i32_228, %c0_i32_231] : memref<32x32xf32, #tpu.memory_space<vmem>> -> memref<1x32xf32, #tpu.memory_space<vmem>>
    %442 = tpu.memref_squeeze %441 : memref<1x32xf32, #tpu.memory_space<vmem>> -> memref<32xf32, #tpu.memory_space<vmem>>
    %443 = tpu.memref_slice %arg5[%c25_i32_229] : memref<32x!tpu.dma_semaphore, #tpu.memory_space<semaphore_mem>> -> memref<1x!tpu.dma_semaphore, #tpu.memory_space<semaphore_mem>>
    %444 = tpu.memref_squeeze %443 : memref<1x!tpu.dma_semaphore, #tpu.memory_space<semaphore_mem>> -> memref<!tpu.dma_semaphore, #tpu.memory_space<semaphore_mem>>
    tpu.wait_dma2 semaphore(%444 : memref<!tpu.dma_semaphore, #tpu.memory_space<semaphore_mem>>) src(%440 : memref<32xf32, #tpu.memory_space<any>>) dst(%442 : memref<32xf32, #tpu.memory_space<vmem>>)
    %c26_i32_232 = arith.constant 26 : i32
    %c26_i32_233 = arith.constant 26 : i32
    %c0_i32_234 = arith.constant 0 : i32
    %445 = tpu.memref_slice %arg2[%237, %c0_i32_234] : memref<65x32xf32, #tpu.memory_space<any>> -> memref<1x32xf32, #tpu.memory_space<any>>
    %446 = tpu.memref_squeeze %445 : memref<1x32xf32, #tpu.memory_space<any>> -> memref<32xf32, #tpu.memory_space<any>>
    %c0_i32_235 = arith.constant 0 : i32
    %447 = tpu.memref_slice %arg4[%c26_i32_232, %c0_i32_235] : memref<32x32xf32, #tpu.memory_space<vmem>> -> memref<1x32xf32, #tpu.memory_space<vmem>>
    %448 = tpu.memref_squeeze %447 : memref<1x32xf32, #tpu.memory_space<vmem>> -> memref<32xf32, #tpu.memory_space<vmem>>
    %449 = tpu.memref_slice %arg5[%c26_i32_233] : memref<32x!tpu.dma_semaphore, #tpu.memory_space<semaphore_mem>> -> memref<1x!tpu.dma_semaphore, #tpu.memory_space<semaphore_mem>>
    %450 = tpu.memref_squeeze %449 : memref<1x!tpu.dma_semaphore, #tpu.memory_space<semaphore_mem>> -> memref<!tpu.dma_semaphore, #tpu.memory_space<semaphore_mem>>
    tpu.wait_dma2 semaphore(%450 : memref<!tpu.dma_semaphore, #tpu.memory_space<semaphore_mem>>) src(%446 : memref<32xf32, #tpu.memory_space<any>>) dst(%448 : memref<32xf32, #tpu.memory_space<vmem>>)
    %c27_i32_236 = arith.constant 27 : i32
    %c27_i32_237 = arith.constant 27 : i32
    %c0_i32_238 = arith.constant 0 : i32
    %451 = tpu.memref_slice %arg2[%246, %c0_i32_238] : memref<65x32xf32, #tpu.memory_space<any>> -> memref<1x32xf32, #tpu.memory_space<any>>
    %452 = tpu.memref_squeeze %451 : memref<1x32xf32, #tpu.memory_space<any>> -> memref<32xf32, #tpu.memory_space<any>>
    %c0_i32_239 = arith.constant 0 : i32
    %453 = tpu.memref_slice %arg4[%c27_i32_236, %c0_i32_239] : memref<32x32xf32, #tpu.memory_space<vmem>> -> memref<1x32xf32, #tpu.memory_space<vmem>>
    %454 = tpu.memref_squeeze %453 : memref<1x32xf32, #tpu.memory_space<vmem>> -> memref<32xf32, #tpu.memory_space<vmem>>
    %455 = tpu.memref_slice %arg5[%c27_i32_237] : memref<32x!tpu.dma_semaphore, #tpu.memory_space<semaphore_mem>> -> memref<1x!tpu.dma_semaphore, #tpu.memory_space<semaphore_mem>>
    %456 = tpu.memref_squeeze %455 : memref<1x!tpu.dma_semaphore, #tpu.memory_space<semaphore_mem>> -> memref<!tpu.dma_semaphore, #tpu.memory_space<semaphore_mem>>
    tpu.wait_dma2 semaphore(%456 : memref<!tpu.dma_semaphore, #tpu.memory_space<semaphore_mem>>) src(%452 : memref<32xf32, #tpu.memory_space<any>>) dst(%454 : memref<32xf32, #tpu.memory_space<vmem>>)
    %c28_i32_240 = arith.constant 28 : i32
    %c28_i32_241 = arith.constant 28 : i32
    %c0_i32_242 = arith.constant 0 : i32
    %457 = tpu.memref_slice %arg2[%255, %c0_i32_242] : memref<65x32xf32, #tpu.memory_space<any>> -> memref<1x32xf32, #tpu.memory_space<any>>
    %458 = tpu.memref_squeeze %457 : memref<1x32xf32, #tpu.memory_space<any>> -> memref<32xf32, #tpu.memory_space<any>>
    %c0_i32_243 = arith.constant 0 : i32
    %459 = tpu.memref_slice %arg4[%c28_i32_240, %c0_i32_243] : memref<32x32xf32, #tpu.memory_space<vmem>> -> memref<1x32xf32, #tpu.memory_space<vmem>>
    %460 = tpu.memref_squeeze %459 : memref<1x32xf32, #tpu.memory_space<vmem>> -> memref<32xf32, #tpu.memory_space<vmem>>
    %461 = tpu.memref_slice %arg5[%c28_i32_241] : memref<32x!tpu.dma_semaphore, #tpu.memory_space<semaphore_mem>> -> memref<1x!tpu.dma_semaphore, #tpu.memory_space<semaphore_mem>>
    %462 = tpu.memref_squeeze %461 : memref<1x!tpu.dma_semaphore, #tpu.memory_space<semaphore_mem>> -> memref<!tpu.dma_semaphore, #tpu.memory_space<semaphore_mem>>
    tpu.wait_dma2 semaphore(%462 : memref<!tpu.dma_semaphore, #tpu.memory_space<semaphore_mem>>) src(%458 : memref<32xf32, #tpu.memory_space<any>>) dst(%460 : memref<32xf32, #tpu.memory_space<vmem>>)
    %c29_i32_244 = arith.constant 29 : i32
    %c29_i32_245 = arith.constant 29 : i32
    %c0_i32_246 = arith.constant 0 : i32
    %463 = tpu.memref_slice %arg2[%264, %c0_i32_246] : memref<65x32xf32, #tpu.memory_space<any>> -> memref<1x32xf32, #tpu.memory_space<any>>
    %464 = tpu.memref_squeeze %463 : memref<1x32xf32, #tpu.memory_space<any>> -> memref<32xf32, #tpu.memory_space<any>>
    %c0_i32_247 = arith.constant 0 : i32
    %465 = tpu.memref_slice %arg4[%c29_i32_244, %c0_i32_247] : memref<32x32xf32, #tpu.memory_space<vmem>> -> memref<1x32xf32, #tpu.memory_space<vmem>>
    %466 = tpu.memref_squeeze %465 : memref<1x32xf32, #tpu.memory_space<vmem>> -> memref<32xf32, #tpu.memory_space<vmem>>
    %467 = tpu.memref_slice %arg5[%c29_i32_245] : memref<32x!tpu.dma_semaphore, #tpu.memory_space<semaphore_mem>> -> memref<1x!tpu.dma_semaphore, #tpu.memory_space<semaphore_mem>>
    %468 = tpu.memref_squeeze %467 : memref<1x!tpu.dma_semaphore, #tpu.memory_space<semaphore_mem>> -> memref<!tpu.dma_semaphore, #tpu.memory_space<semaphore_mem>>
    tpu.wait_dma2 semaphore(%468 : memref<!tpu.dma_semaphore, #tpu.memory_space<semaphore_mem>>) src(%464 : memref<32xf32, #tpu.memory_space<any>>) dst(%466 : memref<32xf32, #tpu.memory_space<vmem>>)
    %c30_i32_248 = arith.constant 30 : i32
    %c30_i32_249 = arith.constant 30 : i32
    %c0_i32_250 = arith.constant 0 : i32
    %469 = tpu.memref_slice %arg2[%273, %c0_i32_250] : memref<65x32xf32, #tpu.memory_space<any>> -> memref<1x32xf32, #tpu.memory_space<any>>
    %470 = tpu.memref_squeeze %469 : memref<1x32xf32, #tpu.memory_space<any>> -> memref<32xf32, #tpu.memory_space<any>>
    %c0_i32_251 = arith.constant 0 : i32
    %471 = tpu.memref_slice %arg4[%c30_i32_248, %c0_i32_251] : memref<32x32xf32, #tpu.memory_space<vmem>> -> memref<1x32xf32, #tpu.memory_space<vmem>>
    %472 = tpu.memref_squeeze %471 : memref<1x32xf32, #tpu.memory_space<vmem>> -> memref<32xf32, #tpu.memory_space<vmem>>
    %473 = tpu.memref_slice %arg5[%c30_i32_249] : memref<32x!tpu.dma_semaphore, #tpu.memory_space<semaphore_mem>> -> memref<1x!tpu.dma_semaphore, #tpu.memory_space<semaphore_mem>>
    %474 = tpu.memref_squeeze %473 : memref<1x!tpu.dma_semaphore, #tpu.memory_space<semaphore_mem>> -> memref<!tpu.dma_semaphore, #tpu.memory_space<semaphore_mem>>
    tpu.wait_dma2 semaphore(%474 : memref<!tpu.dma_semaphore, #tpu.memory_space<semaphore_mem>>) src(%470 : memref<32xf32, #tpu.memory_space<any>>) dst(%472 : memref<32xf32, #tpu.memory_space<vmem>>)
    %c31_i32_252 = arith.constant 31 : i32
    %c31_i32_253 = arith.constant 31 : i32
    %c0_i32_254 = arith.constant 0 : i32
    %475 = tpu.memref_slice %arg2[%282, %c0_i32_254] : memref<65x32xf32, #tpu.memory_space<any>> -> memref<1x32xf32, #tpu.memory_space<any>>
    %476 = tpu.memref_squeeze %475 : memref<1x32xf32, #tpu.memory_space<any>> -> memref<32xf32, #tpu.memory_space<any>>
    %c0_i32_255 = arith.constant 0 : i32
    %477 = tpu.memref_slice %arg4[%c31_i32_252, %c0_i32_255] : memref<32x32xf32, #tpu.memory_space<vmem>> -> memref<1x32xf32, #tpu.memory_space<vmem>>
    %478 = tpu.memref_squeeze %477 : memref<1x32xf32, #tpu.memory_space<vmem>> -> memref<32xf32, #tpu.memory_space<vmem>>
    %479 = tpu.memref_slice %arg5[%c31_i32_253] : memref<32x!tpu.dma_semaphore, #tpu.memory_space<semaphore_mem>> -> memref<1x!tpu.dma_semaphore, #tpu.memory_space<semaphore_mem>>
    %480 = tpu.memref_squeeze %479 : memref<1x!tpu.dma_semaphore, #tpu.memory_space<semaphore_mem>> -> memref<!tpu.dma_semaphore, #tpu.memory_space<semaphore_mem>>
    tpu.wait_dma2 semaphore(%480 : memref<!tpu.dma_semaphore, #tpu.memory_space<semaphore_mem>>) src(%476 : memref<32xf32, #tpu.memory_space<any>>) dst(%478 : memref<32xf32, #tpu.memory_space<vmem>>)
    %c0 = arith.constant 0 : index
    %c0_256 = arith.constant 0 : index
    %481 = vector.load %arg4[%c0, %c0_256] : memref<32x32xf32, #tpu.memory_space<vmem>>, vector<32x32xf32>
    %c0_257 = arith.constant 0 : index
    %c0_258 = arith.constant 0 : index
    %482 = vector.load %arg3[%c0_257, %c0_258] : memref<32x32xf32, #tpu.memory_space<vmem>>, vector<32x32xf32>
    tpu.vector_store %arg3[%c0_257, %c0_258], %481 {strides = array<i32>} : memref<32x32xf32, #tpu.memory_space<vmem>>, vector<32x32xf32>,
    return
  }
  func.func @transform_1(%arg0: i32, %arg1: memref<32xi32, #tpu.memory_space<smem>>) -> (i32, i32) {
    %c0_i32 = arith.constant 0 : i32
    %c0_i32_0 = arith.constant 0 : i32
    return %arg0, %c0_i32 : i32, i32
  }
}

</mosaic_0001>

<bundles_post_ra>
// kernel: tpu_custom_call.1
= control target key start
LH: loop header
LB: loop body
LE: loop exit
PB: predicated region body
PF: predicated region fallthrough
CT: control target
= control target key end

     0   :  { %s1907_s12 = smov [#allocation5]   ;;  %s2028_s0 = inlined_call_operand.vmem [shape: s32[32], index: 0, kind: input, shape index: {}]   ;;  %s2029_s1 = inlined_call_operand.vmem [shape: f32[65,32], index: 1, kind: input, shape index: {}]   ;;  %s2030_s2 = inlined_call_operand.hbm [shape: f32[32,32], index: 2, kind: output, shape index: {}]  }
   0x1   :  { %s8_s11 = sshll.u32 %s2028_s0, 4  ;;  %s9_s11 = int_to_ptr.vmem [resolvable:$true] %s8_s11 }
   0x2   :  { %11 = dma.vmem_to_smem %s9_s11, 16, %s1907_s12, [#allocation4] }
   0x3   :  { %1839 = dma.done.wait [#allocation4], 16 }
   0x4   :  { %1840 = vsyncadd [#allocation4], 4294967280 }
   0x5   :  { %14 = sfence }
   0x6   :  { %15 = vsyncpa [#allocation7], 0  ;;  %s17_s13 = sld [smem:[#allocation5]] }
   0xc   :  { %s18_s16 = scalar_lea.vmem %s2029_s1, %s17_s13 }
   0xd   :  { %v33_v0 = vld [vmem:[%s18_s16] sm:$0x1] }
   0xe   :  { %34 = vst [vmem:[#allocation2] sm:$0x1] %v33_v0 }
   0xf   :  { %52 = vsyncadd [#allocation3], 16  ;;  %s1736_s17 = sld [smem:[#allocation5 + $0x1]] }
  0x15   :  { %s55_s0 = scalar_lea.vmem %s2029_s1, %s1736_s17 }
  0x16   :  { %v72_v1 = vld [vmem:[%s55_s0] sm:$0x1] }
  0x17   :  { %73 = vst [vmem:[#allocation2 + $0x1] sm:$0x1] %v72_v1 }
  0x18   :  { %91 = vsyncadd [#allocation3 + $0x1], 16  ;;  %s1737_s20 = sld [smem:[#allocation5 + $0x2]] }
  0x1e   :  { %s94_s23 = scalar_lea.vmem %s2029_s1, %s1737_s20 }
  0x1f   :  { %v111_v2 = vld [vmem:[%s94_s23] sm:$0x1] }
  0x20   :  { %112 = vst [vmem:[#allocation2 + $0x2] sm:$0x1] %v111_v2 }
  0x21   :  { %130 = vsyncadd [#allocation3 + $0x2], 16  ;;  %s1738_s24 = sld [smem:[#allocation5 + $0x3]] }
  0x27   :  { %s133_s27 = scalar_lea.vmem %s2029_s1, %s1738_s24 }
  0x28   :  { %v150_v3 = vld [vmem:[%s133_s27] sm:$0x1] }
  0x29   :  { %151 = vst [vmem:[#allocation2 + $0x3] sm:$0x1] %v150_v3 }
  0x2a   :  { %169 = vsyncadd [#allocation3 + $0x3], 16  ;;  %s1739_s28 = sld [smem:[#allocation5 + $0x4]] }
  0x30   :  { %s172_s3 = scalar_lea.vmem %s2029_s1, %s1739_s28 }
  0x31   :  { %v189_v4 = vld [vmem:[%s172_s3] sm:$0x1] }
  0x32   :  { %190 = vst [vmem:[#allocation2 + $0x4] sm:$0x1] %v189_v4 }
  0x33   :  { %208 = vsyncadd [#allocation3 + $0x4], 16  ;;  %s1740_s4 = sld [smem:[#allocation5 + $0x5]] }
  0x39   :  { %s211_s7 = scalar_lea.vmem %s2029_s1, %s1740_s4 }
  0x3a   :  { %v228_v5 = vld [vmem:[%s211_s7] sm:$0x1] }
  0x3b   :  { %229 = vst [vmem:[#allocation2 + $0x5] sm:$0x1] %v228_v5 }
  0x3c   :  { %247 = vsyncadd [#allocation3 + $0x5], 16  ;;  %s1741_s8 = sld [smem:[#allocation5 + $0x6]] }
  0x42   :  { %s250_s11 = scalar_lea.vmem %s2029_s1, %s1741_s8 }
  0x43   :  { %v267_v6 = vld [vmem:[%s250_s11] sm:$0x1] }
  0x44   :  { %268 = vst [vmem:[#allocation2 + $0x6] sm:$0x1] %v267_v6 }
  0x45   :  { %286 = vsyncadd [#allocation3 + $0x6], 16  ;;  %s1742_s12 = sld [smem:[#allocation5 + $0x7]] }
  0x4b   :  { %s289_s15 = scalar_lea.vmem %s2029_s1, %s1742_s12 }
  0x4c   :  { %v306_v7 = vld [vmem:[%s289_s15] sm:$0x1] }
  0x4d   :  { %307 = vst [vmem:[#allocation2 + $0x7] sm:$0x1] %v306_v7 }
  0x4e   :  { %325 = vsyncadd [#allocation3 + $0x7], 16  ;;  %s1743_s16 = sld [smem:[#allocation5 + $0x8]] }
  0x54   :  { %s328_s19 = scalar_lea.vmem %s2029_s1, %s1743_s16 }
  0x55   :  { %v345_v8 = vld [vmem:[%s328_s19] sm:$0x1] }
  0x56   :  { %346 = vst [vmem:[#allocation2 + $0x8] sm:$0x1] %v345_v8 }
  0x57   :  { %364 = vsyncadd [#allocation3 + $0x8], 16  ;;  %s1744_s0 = sld [smem:[#allocation5 + $0x9]] }
  0x5d   :  { %s367_s22 = scalar_lea.vmem %s2029_s1, %s1744_s0 }
  0x5e   :  { %v384_v9 = vld [vmem:[%s367_s22] sm:$0x1] }
  0x5f   :  { %385 = vst [vmem:[#allocation2 + $0x9] sm:$0x1] %v384_v9 }
  0x60   :  { %403 = vsyncadd [#allocation3 + $0x9], 16  ;;  %s1745_s23 = sld [smem:[#allocation5 + $0xa]] }
  0x66   :  { %s406_s26 = scalar_lea.vmem %s2029_s1, %s1745_s23 }
  0x67   :  { %v423_v10 = vld [vmem:[%s406_s26] sm:$0x1] }
  0x68   :  { %424 = vst [vmem:[#allocation2 + $0xa] sm:$0x1] %v423_v10 }
  0x69   :  { %442 = vsyncadd [#allocation3 + $0xa], 16  ;;  %s1746_s27 = sld [smem:[#allocation5 + $0xb]] }
  0x6f   :  { %s445_s30 = scalar_lea.vmem %s2029_s1, %s1746_s27 }
  0x70   :  { %v462_v11 = vld [vmem:[%s445_s30] sm:$0x1] }
  0x71   :  { %463 = vst [vmem:[#allocation2 + $0xb] sm:$0x1] %v462_v11 }
  0x72   :  { %481 = vsyncadd [#allocation3 + $0xb], 16  ;;  %s1747_s3 = sld [smem:[#allocation5 + $0xc]] }
  0x78   :  { %s484_s6 = scalar_lea.vmem %s2029_s1, %s1747_s3 }
  0x79   :  { %v501_v12 = vld [vmem:[%s484_s6] sm:$0x1] }
  0x7a   :  { %502 = vst [vmem:[#allocation2 + $0xc] sm:$0x1] %v501_v12 }
  0x7b   :  { %520 = vsyncadd [#allocation3 + $0xc], 16  ;;  %s1748_s7 = sld [smem:[#allocation5 + $0xd]] }
  0x81   :  { %s523_s10 = scalar_lea.vmem %s2029_s1, %s1748_s7 }
  0x82   :  { %v540_v13 = vld [vmem:[%s523_s10] sm:$0x1] }
  0x83   :  { %541 = vst [vmem:[#allocation2 + $0xd] sm:$0x1] %v540_v13 }
  0x84   :  { %559 = vsyncadd [#allocation3 + $0xd], 16  ;;  %s1749_s11 = sld [smem:[#allocation5 + $0xe]] }
  0x8a   :  { %s562_s14 = scalar_lea.vmem %s2029_s1, %s1749_s11 }
  0x8b   :  { %v579_v14 = vld [vmem:[%s562_s14] sm:$0x1] }
  0x8c   :  { %580 = vst [vmem:[#allocation2 + $0xe] sm:$0x1] %v579_v14 }
  0x8d   :  { %598 = vsyncadd [#allocation3 + $0xe], 16  ;;  %s1750_s15 = sld [smem:[#allocation5 + $0xf]] }
  0x93   :  { %s601_s18 = scalar_lea.vmem %s2029_s1, %s1750_s15 }
  0x94   :  { %v618_v15 = vld [vmem:[%s601_s18] sm:$0x1] }
  0x95   :  { %619 = vst [vmem:[#allocation2 + $0xf] sm:$0x1] %v618_v15 }
  0x96   :  { %637 = vsyncadd [#allocation3 + $0xf], 16  ;;  %s1751_s19 = sld [smem:[#allocation5 + $0x10]] }
  0x9c   :  { %s640_s21 = scalar_lea.vmem %s2029_s1, %s1751_s19 }
  0x9d   :  { %v657_v16 = vld [vmem:[%s640_s21] sm:$0x1] }
  0x9e   :  { %658 = vst [vmem:[#allocation2 + $0x10] sm:$0x1] %v657_v16 }
  0x9f   :  { %676 = vsyncadd [#allocation3 + $0x10], 16  ;;  %s1752_s22 = sld [smem:[#allocation5 + $0x11]] }
  0xa5   :  { %s679_s25 = scalar_lea.vmem %s2029_s1, %s1752_s22 }
  0xa6   :  { %v696_v17 = vld [vmem:[%s679_s25] sm:$0x1] }
  0xa7   :  { %697 = vst [vmem:[#allocation2 + $0x11] sm:$0x1] %v696_v17 }
  0xa8   :  { %715 = vsyncadd [#allocation3 + $0x11], 16  ;;  %s1753_s26 = sld [smem:[#allocation5 + $0x12]] }
  0xae   :  { %s718_s29 = scalar_lea.vmem %s2029_s1, %s1753_s26 }
  0xaf   :  { %v735_v18 = vld [vmem:[%s718_s29] sm:$0x1] }
  0xb0   :  { %736 = vst [vmem:[#allocation2 + $0x12] sm:$0x1] %v735_v18 }
  0xb1   :  { %754 = vsyncadd [#allocation3 + $0x12], 16  ;;  %s1754_s30 = sld [smem:[#allocation5 + $0x13]] }
  0xb7   :  { %s757_s5 = scalar_lea.vmem %s2029_s1, %s1754_s30 }
  0xb8   :  { %v774_v19 = vld [vmem:[%s757_s5] sm:$0x1] }
  0xb9   :  { %775 = vst [vmem:[#allocation2 + $0x13] sm:$0x1] %v774_v19 }
  0xba   :  { %793 = vsyncadd [#allocation3 + $0x13], 16  ;;  %s1755_s6 = sld [smem:[#allocation5 + $0x14]] }
  0xc0   :  { %s796_s9 = scalar_lea.vmem %s2029_s1, %s1755_s6 }
  0xc1   :  { %v813_v20 = vld [vmem:[%s796_s9] sm:$0x1] }
  0xc2   :  { %814 = vst [vmem:[#allocation2 + $0x14] sm:$0x1] %v813_v20 }
  0xc3   :  { %832 = vsyncadd [#allocation3 + $0x14], 16  ;;  %s1756_s10 = sld [smem:[#allocation5 + $0x15]] }
  0xc9   :  { %s835_s13 = scalar_lea.vmem %s2029_s1, %s1756_s10 }
  0xca   :  { %v852_v21 = vld [vmem:[%s835_s13] sm:$0x1] }
  0xcb   :  { %853 = vst [vmem:[#allocation2 + $0x15] sm:$0x1] %v852_v21 }
  0xcc   :  { %871 = vsyncadd [#allocation3 + $0x15], 16  ;;  %s1757_s14 = sld [smem:[#allocation5 + $0x16]] }
  0xd2   :  { %s874_s17 = scalar_lea.vmem %s2029_s1, %s1757_s14 }
  0xd3   :  { %v891_v22 = vld [vmem:[%s874_s17] sm:$0x1] }
  0xd4   :  { %892 = vst [vmem:[#allocation2 + $0x16] sm:$0x1] %v891_v22 }
  0xd5   :  { %910 = vsyncadd [#allocation3 + $0x16], 16  ;;  %s1758_s18 = sld [smem:[#allocation5 + $0x17]] }
  0xdb   :  { %s913_s20 = scalar_lea.vmem %s2029_s1, %s1758_s18 }
  0xdc   :  { %v930_v23 = vld [vmem:[%s913_s20] sm:$0x1] }
  0xdd   :  { %931 = vst [vmem:[#allocation2 + $0x17] sm:$0x1] %v930_v23 }
  0xde   :  { %949 = vsyncadd [#allocation3 + $0x17], 16  ;;  %s1759_s21 = sld [smem:[#allocation5 + $0x18]] }
  0xe4   :  { %s952_s24 = scalar_lea.vmem %s2029_s1, %s1759_s21 }
  0xe5   :  { %v969_v24 = vld [vmem:[%s952_s24] sm:$0x1] }
  0xe6   :  { %970 = vst [vmem:[#allocation2 + $0x18] sm:$0x1] %v969_v24 }
  0xe7   :  { %988 = vsyncadd [#allocation3 + $0x18], 16  ;;  %s1760_s25 = sld [smem:[#allocation5 + $0x19]] }
  0xed   :  { %s991_s28 = scalar_lea.vmem %s2029_s1, %s1760_s25 }
  0xee   :  { %v1008_v25 = vld [vmem:[%s991_s28] sm:$0x1] }
  0xef   :  { %1009 = vst [vmem:[#allocation2 + $0x19] sm:$0x1] %v1008_v25 }
  0xf0   :  { %1027 = vsyncadd [#allocation3 + $0x19], 16  ;;  %s1761_s29 = sld [smem:[#allocation5 + $0x1a]] }
  0xf6   :  { %s1030_s4 = scalar_lea.vmem %s2029_s1, %s1761_s29 }
  0xf7   :  { %v1047_v26 = vld [vmem:[%s1030_s4] sm:$0x1] }
  0xf8   :  { %1048 = vst [vmem:[#allocation2 + $0x1a] sm:$0x1] %v1047_v26 }
  0xf9   :  { %1066 = vsyncadd [#allocation3 + $0x1a], 16  ;;  %s1762_s5 = sld [smem:[#allocation5 + $0x1b]] }
  0xff   :  { %s1069_s8 = scalar_lea.vmem %s2029_s1, %s1762_s5 }
 0x100   :  { %v1086_v27 = vld [vmem:[%s1069_s8] sm:$0x1] }
 0x101   :  { %1087 = vst [vmem:[#allocation2 + $0x1b] sm:$0x1] %v1086_v27 }
 0x102   :  { %1105 = vsyncadd [#allocation3 + $0x1b], 16  ;;  %s1763_s9 = sld [smem:[#allocation5 + $0x1c]] }
 0x108   :  { %s1108_s12 = scalar_lea.vmem %s2029_s1, %s1763_s9 }
 0x109   :  { %v1125_v28 = vld [vmem:[%s1108_s12] sm:$0x1] }
 0x10a   :  { %1126 = vst [vmem:[#allocation2 + $0x1c] sm:$0x1] %v1125_v28 }
 0x10b   :  { %1144 = vsyncadd [#allocation3 + $0x1c], 16  ;;  %s1764_s13 = sld [smem:[#allocation5 + $0x1d]] }
 0x111   :  { %s1147_s16 = scalar_lea.vmem %s2029_s1, %s1764_s13 }
 0x112   :  { %v1164_v29 = vld [vmem:[%s1147_s16] sm:$0x1] }
 0x113   :  { %1165 = vst [vmem:[#allocation2 + $0x1d] sm:$0x1] %v1164_v29 }
 0x114   :  { %1183 = vsyncadd [#allocation3 + $0x1d], 16  ;;  %s1765_s17 = sld [smem:[#allocation5 + $0x1e]] }
 0x11a   :  { %s1186_s0 = scalar_lea.vmem %s2029_s1, %s1765_s17 }
 0x11b   :  { %v1203_v30 = vld [vmem:[%s1186_s0] sm:$0x1] }
 0x11c   :  { %1204 = vst [vmem:[#allocation2 + $0x1e] sm:$0x1] %v1203_v30 }
 0x11d   :  { %1222 = vsyncadd [#allocation3 + $0x1e], 16  ;;  %s1766_s20 = sld [smem:[#allocation5 + $0x1f]] }
 0x123   :  { %s1225_s23 = scalar_lea.vmem %s2029_s1, %s1766_s20 }
 0x124   :  { %v1242_v31 = vld [vmem:[%s1225_s23] sm:$0x1] }
 0x125   :  { %1243 = vst [vmem:[#allocation2 + $0x1f] sm:$0x1] %v1242_v31 }
 0x126   :  { %1261 = vsyncadd [#allocation3 + $0x1f], 16 }
 0x127   :  { %1841 = dma.done.wait [#allocation3], 16 }
 0x128   :  { %1842 = vsyncadd [#allocation3], 4294967280 }
 0x129   :  { %1843 = dma.done.wait [#allocation3 + $0x1], 16 }
 0x12a   :  { %1844 = vsyncadd [#allocation3 + $0x1], 4294967280 }
 0x12b   :  { %1845 = dma.done.wait [#allocation3 + $0x2], 16 }
 0x12c   :  { %1846 = vsyncadd [#allocation3 + $0x2], 4294967280 }
 0x12d   :  { %1847 = dma.done.wait [#allocation3 + $0x3], 16 }
 0x12e   :  { %1848 = vsyncadd [#allocation3 + $0x3], 4294967280 }
 0x12f   :  { %1849 = dma.done.wait [#allocation3 + $0x4], 16 }
 0x130   :  { %1850 = vsyncadd [#allocation3 + $0x4], 4294967280 }
 0x131   :  { %1851 = dma.done.wait [#allocation3 + $0x5], 16 }
 0x132   :  { %1852 = vsyncadd [#allocation3 + $0x5], 4294967280 }
 0x133   :  { %1853 = dma.done.wait [#allocation3 + $0x6], 16 }
 0x134   :  { %1854 = vsyncadd [#allocation3 + $0x6], 4294967280 }
 0x135   :  { %1855 = dma.done.wait [#allocation3 + $0x7], 16 }
 0x136   :  { %1856 = vsyncadd [#allocation3 + $0x7], 4294967280 }
 0x137   :  { %1857 = dma.done.wait [#allocation3 + $0x8], 16 }
 0x138   :  { %1858 = vsyncadd [#allocation3 + $0x8], 4294967280 }
 0x139   :  { %1859 = dma.done.wait [#allocation3 + $0x9], 16 }
 0x13a   :  { %1860 = vsyncadd [#allocation3 + $0x9], 4294967280 }
 0x13b   :  { %1861 = dma.done.wait [#allocation3 + $0xa], 16 }
 0x13c   :  { %1862 = vsyncadd [#allocation3 + $0xa], 4294967280 }
 0x13d   :  { %1863 = dma.done.wait [#allocation3 + $0xb], 16 }
 0x13e   :  { %1864 = vsyncadd [#allocation3 + $0xb], 4294967280 }
 0x13f   :  { %1865 = dma.done.wait [#allocation3 + $0xc], 16 }
 0x140   :  { %1866 = vsyncadd [#allocation3 + $0xc], 4294967280 }
 0x141   :  { %1867 = dma.done.wait [#allocation3 + $0xd], 16 }
 0x142   :  { %1868 = vsyncadd [#allocation3 + $0xd], 4294967280 }
 0x143   :  { %1869 = dma.done.wait [#allocation3 + $0xe], 16 }
 0x144   :  { %1870 = vsyncadd [#allocation3 + $0xe], 4294967280 }
 0x145   :  { %1871 = dma.done.wait [#allocation3 + $0xf], 16 }
 0x146   :  { %1872 = vsyncadd [#allocation3 + $0xf], 4294967280 }
 0x147   :  { %1873 = dma.done.wait [#allocation3 + $0x10], 16 }
 0x148   :  { %1874 = vsyncadd [#allocation3 + $0x10], 4294967280 }
 0x149   :  { %1875 = dma.done.wait [#allocation3 + $0x11], 16 }
 0x14a   :  { %1876 = vsyncadd [#allocation3 + $0x11], 4294967280 }
 0x14b   :  { %1877 = dma.done.wait [#allocation3 + $0x12], 16 }
 0x14c   :  { %1878 = vsyncadd [#allocation3 + $0x12], 4294967280 }
 0x14d   :  { %1879 = dma.done.wait [#allocation3 + $0x13], 16 }
 0x14e   :  { %1880 = vsyncadd [#allocation3 + $0x13], 4294967280 }
 0x14f   :  { %1881 = dma.done.wait [#allocation3 + $0x14], 16 }
 0x150   :  { %1882 = vsyncadd [#allocation3 + $0x14], 4294967280 }
 0x151   :  { %1883 = dma.done.wait [#allocation3 + $0x15], 16 }
 0x152   :  { %1884 = vsyncadd [#allocation3 + $0x15], 4294967280 }
 0x153   :  { %1885 = dma.done.wait [#allocation3 + $0x16], 16 }
 0x154   :  { %1886 = vsyncadd [#allocation3 + $0x16], 4294967280 }
 0x155   :  { %1887 = dma.done.wait [#allocation3 + $0x17], 16 }
 0x156   :  { %1888 = vsyncadd [#allocation3 + $0x17], 4294967280 }
 0x157   :  { %1889 = dma.done.wait [#allocation3 + $0x18], 16 }
 0x158   :  { %1890 = vsyncadd [#allocation3 + $0x18], 4294967280 }
 0x159   :  { %1891 = dma.done.wait [#allocation3 + $0x19], 16 }
 0x15a   :  { %1892 = vsyncadd [#allocation3 + $0x19], 4294967280 }
 0x15b   :  { %1893 = dma.done.wait [#allocation3 + $0x1a], 16 }
 0x15c   :  { %1894 = vsyncadd [#allocation3 + $0x1a], 4294967280 }
 0x15d   :  { %1895 = dma.done.wait [#allocation3 + $0x1b], 16 }
 0x15e   :  { %1896 = vsyncadd [#allocation3 + $0x1b], 4294967280 }
 0x15f   :  { %1897 = dma.done.wait [#allocation3 + $0x1c], 16 }
 0x160   :  { %1898 = vsyncadd [#allocation3 + $0x1c], 4294967280 }
 0x161   :  { %1899 = dma.done.wait [#allocation3 + $0x1d], 16 }
 0x162   :  { %1900 = vsyncadd [#allocation3 + $0x1d], 4294967280 }
 0x163   :  { %1901 = dma.done.wait [#allocation3 + $0x1e], 16 }
 0x164   :  { %1902 = vsyncadd [#allocation3 + $0x1e], 4294967280 }
 0x165   :  { %1903 = dma.done.wait [#allocation3 + $0x1f], 16 }
 0x166   :  { %1904 = vsyncadd [#allocation3 + $0x1f], 4294967280  ;;  %vm1330_vm0 = vcmask 261120   ;;  %s1908_s1 = smov [#allocation6]   ;;  %s1341_s27 = sshll.u32 %s2030_s2, 4  ;;  %v1326_v32 = vld [vmem:[#allocation2] sm:$0xff]  ;;  %s1342_s27 = int_to_ptr.hbm [resolvable:$true] %s1341_s27 }
 0x167   :  { %s1339_s24 = sshll.u32 %s1908_s1, 4  ;;  %v1327_v33 = vld [vmem:[#allocation2 + $0x8] sm:$0xff]  ;;  %v1328_v34 = vld [vmem:[#allocation2 + $0x10] sm:$0xff]  ;;  %1331 = vst.msk [vmem:[#allocation6] sm:$0xff] %vm1330_vm0, %v1326_v32  ;;  %v1329_v35 = vld [vmem:[#allocation2 + $0x18] sm:$0xff]  ;;  %s1909_s28 = smov 128   ;;  %s1340_s24 = int_to_ptr.vmem [resolvable:$true] %s1339_s24 }
 0x168   :  { %1332 = vst.msk [vmem:[#allocation6 + $0x8] sm:$0xff] %vm1330_vm0, %v1327_v33  ;;  %s1910_s29 = smov 8  }
 0x169   :  { %1333 = vst.msk [vmem:[#allocation6 + $0x10] sm:$0xff] %vm1330_vm0, %v1328_v34 }
 0x16a   :  { %1334 = vst.msk [vmem:[#allocation6 + $0x18] sm:$0xff] %vm1330_vm0, %v1329_v35 }
 0x16b   :  { %1347 = dma.vmem_to_hbm [thread:$0]  %s1340_s24, 512, %s1342_s27, [#allocation7], %s1909_s28, %s1909_s28, %s1910_s29  }
 0x16c   :  { %1905 = dma.done.wait [#allocation7], 512  }
 0x16d   :  { %1906 = vsyncadd [#allocation7], 4294966784 }
 0x16e   :  { %1352 = vsyncpa [#allocation7], 1 }
 0x16f   :  { %1353 = vsyncmov [#allocation3] }
 0x172   :  { %s1354_s30 = vpop.sfrf %1353 }
 0x173   :  { %p1767_p0 = scmp.ne.s32.totalorder %s1354_s30, 0 }
 0x175   :  { %1358 = shalt.err (%p1767_p0)  }
 0x176   :  { %1360 = vsyncmov [#allocation3 + $0x1] }
 0x179   :  { %s1361_s2 = vpop.sfrf %1360 }
 0x17a   :  { %p1768_p1 = scmp.ne.s32.totalorder %s1361_s2, 0 }
 0x17c   :  { %1365 = shalt.err (%p1768_p1)  }
 0x17d   :  { %1367 = vsyncmov [#allocation3 + $0x2] }
 0x180   :  { %s1368_s3 = vpop.sfrf %1367 }
 0x181   :  { %p1769_p2 = scmp.ne.s32.totalorder %s1368_s3, 0 }
 0x183   :  { %1372 = shalt.err (%p1769_p2)  }
 0x184   :  { %1374 = vsyncmov [#allocation3 + $0x3] }
 0x187   :  { %s1375_s4 = vpop.sfrf %1374 }
 0x188   :  { %p1770_p3 = scmp.ne.s32.totalorder %s1375_s4, 0 }
 0x18a   :  { %1379 = shalt.err (%p1770_p3)  }
 0x18b   :  { %1381 = vsyncmov [#allocation3 + $0x4] }
 0x18e   :  { %s1382_s5 = vpop.sfrf %1381 }
 0x18f   :  { %p1771_p4 = scmp.ne.s32.totalorder %s1382_s5, 0 }
 0x191   :  { %1386 = shalt.err (%p1771_p4)  }
 0x192   :  { %1388 = vsyncmov [#allocation3 + $0x5] }
 0x195   :  { %s1389_s6 = vpop.sfrf %1388 }
 0x196   :  { %p1772_p5 = scmp.ne.s32.totalorder %s1389_s6, 0 }
 0x198   :  { %1393 = shalt.err (%p1772_p5)  }
 0x199   :  { %1395 = vsyncmov [#allocation3 + $0x6] }
 0x19c   :  { %s1396_s7 = vpop.sfrf %1395 }
 0x19d   :  { %p1773_p6 = scmp.ne.s32.totalorder %s1396_s7, 0 }
 0x19f   :  { %1400 = shalt.err (%p1773_p6)  }
 0x1a0   :  { %1402 = vsyncmov [#allocation3 + $0x7] }
 0x1a3   :  { %s1403_s8 = vpop.sfrf %1402 }
 0x1a4   :  { %p1774_p7 = scmp.ne.s32.totalorder %s1403_s8, 0 }
 0x1a6   :  { %1407 = shalt.err (%p1774_p7)  }
 0x1a7   :  { %1409 = vsyncmov [#allocation3 + $0x8] }
 0x1aa   :  { %s1410_s9 = vpop.sfrf %1409 }
 0x1ab   :  { %p1775_p8 = scmp.ne.s32.totalorder %s1410_s9, 0 }
 0x1ad   :  { %1414 = shalt.err (%p1775_p8)  }
 0x1ae   :  { %1416 = vsyncmov [#allocation3 + $0x9] }
 0x1b1   :  { %s1417_s10 = vpop.sfrf %1416 }
 0x1b2   :  { %p1776_p9 = scmp.ne.s32.totalorder %s1417_s10, 0 }
 0x1b4   :  { %1421 = shalt.err (%p1776_p9)  }
 0x1b5   :  { %1423 = vsyncmov [#allocation3 + $0xa] }
 0x1b8   :  { %s1424_s11 = vpop.sfrf %1423 }
 0x1b9   :  { %p1777_p10 = scmp.ne.s32.totalorder %s1424_s11, 0 }
 0x1bb   :  { %1428 = shalt.err (%p1777_p10)  }
 0x1bc   :  { %1430 = vsyncmov [#allocation3 + $0xb] }
 0x1bf   :  { %s1431_s12 = vpop.sfrf %1430 }
 0x1c0   :  { %p1778_p11 = scmp.ne.s32.totalorder %s1431_s12, 0 }
 0x1c2   :  { %1435 = shalt.err (%p1778_p11)  }
 0x1c3   :  { %1437 = vsyncmov [#allocation3 + $0xc] }
 0x1c6   :  { %s1438_s13 = vpop.sfrf %1437 }
 0x1c7   :  { %p1779_p12 = scmp.ne.s32.totalorder %s1438_s13, 0 }
 0x1c9   :  { %1442 = shalt.err (%p1779_p12)  }
 0x1ca   :  { %1444 = vsyncmov [#allocation3 + $0xd] }
 0x1cd   :  { %s1445_s14 = vpop.sfrf %1444 }
 0x1ce   :  { %p1780_p13 = scmp.ne.s32.totalorder %s1445_s14, 0 }
 0x1d0   :  { %1449 = shalt.err (%p1780_p13)  }
 0x1d1   :  { %1451 = vsyncmov [#allocation3 + $0xe] }
 0x1d4   :  { %s1452_s15 = vpop.sfrf %1451 }
 0x1d5   :  { %p1781_p0 = scmp.ne.s32.totalorder %s1452_s15, 0 }
 0x1d7   :  { %1456 = shalt.err (%p1781_p0)  }
 0x1d8   :  { %1458 = vsyncmov [#allocation3 + $0xf] }
 0x1db   :  { %s1459_s16 = vpop.sfrf %1458 }
 0x1dc   :  { %p1782_p1 = scmp.ne.s32.totalorder %s1459_s16, 0 }
 0x1de   :  { %1463 = shalt.err (%p1782_p1)  }
 0x1df   :  { %1465 = vsyncmov [#allocation3 + $0x10] }
 0x1e2   :  { %s1466_s17 = vpop.sfrf %1465 }
 0x1e3   :  { %p1783_p2 = scmp.ne.s32.totalorder %s1466_s17, 0 }
 0x1e5   :  { %1470 = shalt.err (%p1783_p2)  }
 0x1e6   :  { %1472 = vsyncmov [#allocation3 + $0x11] }
 0x1e9   :  { %s1473_s18 = vpop.sfrf %1472 }
 0x1ea   :  { %p1784_p3 = scmp.ne.s32.totalorder %s1473_s18, 0 }
 0x1ec   :  { %1477 = shalt.err (%p1784_p3)  }
 0x1ed   :  { %1479 = vsyncmov [#allocation3 + $0x12] }
 0x1f0   :  { %s1480_s19 = vpop.sfrf %1479 }
 0x1f1   :  { %p1785_p4 = scmp.ne.s32.totalorder %s1480_s19, 0 }
 0x1f3   :  { %1484 = shalt.err (%p1785_p4)  }
 0x1f4   :  { %1486 = vsyncmov [#allocation3 + $0x13] }
 0x1f7   :  { %s1487_s0 = vpop.sfrf %1486 }
 0x1f8   :  { %p1786_p5 = scmp.ne.s32.totalorder %s1487_s0, 0 }
 0x1fa   :  { %1491 = shalt.err (%p1786_p5)  }
 0x1fb   :  { %1493 = vsyncmov [#allocation3 + $0x14] }
 0x1fe   :  { %s1494_s20 = vpop.sfrf %1493 }
 0x1ff   :  { %p1787_p6 = scmp.ne.s32.totalorder %s1494_s20, 0 }
 0x201   :  { %1498 = shalt.err (%p1787_p6)  }
 0x202   :  { %1500 = vsyncmov [#allocation3 + $0x15] }
 0x205   :  { %s1501_s21 = vpop.sfrf %1500 }
 0x206   :  { %p1788_p7 = scmp.ne.s32.totalorder %s1501_s21, 0 }
 0x208   :  { %1505 = shalt.err (%p1788_p7)  }
 0x209   :  { %1507 = vsyncmov [#allocation3 + $0x16] }
 0x20c   :  { %s1508_s22 = vpop.sfrf %1507 }
 0x20d   :  { %p1789_p8 = scmp.ne.s32.totalorder %s1508_s22, 0 }
 0x20f   :  { %1512 = shalt.err (%p1789_p8)  }
 0x210   :  { %1514 = vsyncmov [#allocation3 + $0x17] }
 0x213   :  { %s1515_s23 = vpop.sfrf %1514 }
 0x214   :  { %p1790_p9 = scmp.ne.s32.totalorder %s1515_s23, 0 }
 0x216   :  { %1519 = shalt.err (%p1790_p9)  }
 0x217   :  { %1521 = vsyncmov [#allocation3 + $0x18] }
 0x21a   :  { %s1522_s1 = vpop.sfrf %1521 }
 0x21b   :  { %p1791_p10 = scmp.ne.s32.totalorder %s1522_s1, 0 }
 0x21d   :  { %1526 = shalt.err (%p1791_p10)  }
 0x21e   :  { %1528 = vsyncmov [#allocation3 + $0x19] }
 0x221   :  { %s1529_s24 = vpop.sfrf %1528 }
 0x222   :  { %p1792_p11 = scmp.ne.s32.totalorder %s1529_s24, 0 }
 0x224   :  { %1533 = shalt.err (%p1792_p11)  }
 0x225   :  { %1535 = vsyncmov [#allocation3 + $0x1a] }
 0x228   :  { %s1536_s25 = vpop.sfrf %1535 }
 0x229   :  { %p1793_p12 = scmp.ne.s32.totalorder %s1536_s25, 0 }
 0x22b   :  { %1540 = shalt.err (%p1793_p12)  }
 0x22c   :  { %1542 = vsyncmov [#allocation3 + $0x1b] }
 0x22f   :  { %s1543_s26 = vpop.sfrf %1542 }
 0x230   :  { %p1794_p13 = scmp.ne.s32.totalorder %s1543_s26, 0 }
 0x232   :  { %1547 = shalt.err (%p1794_p13)  }
 0x233   :  { %1549 = vsyncmov [#allocation3 + $0x1c] }
 0x236   :  { %s1550_s27 = vpop.sfrf %1549 }
 0x237   :  { %p1795_p0 = scmp.ne.s32.totalorder %s1550_s27, 0 }
 0x239   :  { %1554 = shalt.err (%p1795_p0)  }
 0x23a   :  { %1556 = vsyncmov [#allocation3 + $0x1d] }
 0x23d   :  { %s1557_s28 = vpop.sfrf %1556 }
 0x23e   :  { %p1796_p1 = scmp.ne.s32.totalorder %s1557_s28, 0 }
 0x240   :  { %1561 = shalt.err (%p1796_p1)  }
 0x241   :  { %1563 = vsyncmov [#allocation3 + $0x1e] }
 0x244   :  { %s1564_s29 = vpop.sfrf %1563 }
 0x245   :  { %p1797_p2 = scmp.ne.s32.totalorder %s1564_s29, 0 }
 0x247   :  { %1568 = shalt.err (%p1797_p2)  }
 0x248   :  { %1570 = vsyncmov [#allocation3 + $0x1f] }
 0x24b   :  { %s1571_s30 = vpop.sfrf %1570 }
 0x24c   :  { %p1798_p3 = scmp.ne.s32.totalorder %s1571_s30, 0 }
 0x24e   :  { %1575 = shalt.err (%p1798_p3)  }

</bundles_post_ra>
